<compile_context>
chip_gen: v7x
topology: tpu7x:2x2x1
jax: 0.10.0
libtpu: 0.0.40
codegen_flags: <defaults>
</compile_context>

<pallas_src>
import numpy as np

import jax
import jax.numpy as jnp
from jax.experimental import pallas as pl
from jax.experimental.pallas import tpu as pltpu


# ----------------------------------------------------------------------------
# Synthetic cfg (what parse_cfg would return), deterministic & self-contained.
# ----------------------------------------------------------------------------
NET_INFO = {'type': 'net', 'height': '16', 'width': '16', 'channels': '3'}
BLOCKS = [
    {'type': 'convolutional', 'batch_normalize': '1', 'filters': '8',  'size': '3', 'stride': '1', 'pad': '1', 'activation': 'leaky'},   # 0  -> (B,8,16,16)
    {'type': 'convolutional', 'batch_normalize': '1', 'filters': '16', 'size': '3', 'stride': '2', 'pad': '1', 'activation': 'leaky'},   # 1  -> (B,16,8,8)
    {'type': 'convolutional', 'batch_normalize': '1', 'filters': '8',  'size': '1', 'stride': '1', 'pad': '1', 'activation': 'leaky'},   # 2  -> (B,8,8,8)
    {'type': 'convolutional', 'batch_normalize': '1', 'filters': '16', 'size': '3', 'stride': '1', 'pad': '1', 'activation': 'leaky'},   # 3  -> (B,16,8,8)
    {'type': 'shortcut', 'from': '-3', 'activation': 'linear'},                                                                          # 4  -> (B,16,8,8)
    {'type': 'convolutional', 'batch_normalize': '1', 'filters': '18', 'size': '1', 'stride': '1', 'pad': '1', 'activation': 'linear'},  # 5  -> (B,18,8,8)
    {'type': 'yolo', 'mask': '0,1,2', 'anchors': '2,3, 4,5, 6,8, 8,10, 10,12, 14,14', 'classes': '1', 'num': '6'},                        # 6
    {'type': 'route', 'layers': '-3'},                                                                                                   # 7  -> (B,16,8,8)
    {'type': 'convolutional', 'batch_normalize': '1', 'filters': '8',  'size': '1', 'stride': '1', 'pad': '1', 'activation': 'leaky'},   # 8  -> (B,8,8,8)
    {'type': 'upsample', 'stride': '2'},                                                                                                 # 9  -> (B,8,16,16)
    {'type': 'route', 'layers': '-1, -10'},                                                                                              # 10 -> (B,16,16,16)
    {'type': 'convolutional', 'batch_normalize': '0', 'filters': '18', 'size': '1', 'stride': '1', 'pad': '1', 'activation': 'linear'},  # 11 -> (B,18,16,16)
    {'type': 'yolo', 'mask': '3,4,5', 'anchors': '2,3, 4,5, 6,8, 8,10, 10,12, 14,14', 'classes': '1', 'num': '6'},                        # 12
]

# 3x3 tap offsets, (kh, kw) row-major — matches the (kh, kw, cin) weight order.
_TAP_OFFSETS = [(dh, dw) for dh in (-1, 0, 1) for dw in (-1, 0, 1)]


# ----------------------------------------------------------------------------
# Trace-time constants (data-independent): boundary masks, lane select/bcast.
# ----------------------------------------------------------------------------
def _boundary_masks(B, H, W):
    """(9, B*H*W) f32 validity masks for the 9 taps of a same-pad 3x3 conv."""
    pos = np.arange(B * H * W) % (H * W)
    hh, ww = pos // W, pos % W
    m = np.stack([((hh + dh >= 0) & (hh + dh < H) &
                   (ww + dw >= 0) & (ww + dw < W)) for dh, dw in _TAP_OFFSETS])
    return m.astype(np.float32)


def _downsample_matrix(B, H, W, s):
    """0/1 (B*H*W, B*Ho*Wo) lane selection: keep spatial rows/cols 0, s, 2s,..."""
    Ho, Wo = -(-H // s), -(-W // s)
    mo = np.arange(B * Ho * Wo)
    b, r = mo // (Ho * Wo), mo % (Ho * Wo)
    mi = b * H * W + (r // Wo) * s * W + (r % Wo) * s
    S = np.zeros((B * H * W, B * Ho * Wo), np.float32)
    S[mi, mo] = 1.0
    return S


def _upsample_matrix(B, H, W, s):
    """0/1 (B*H*W, B*Hs*Ws) lane broadcast: nearest-neighbour x`s` upsample."""
    Hu, Wu = H * s, W * s
    mo = np.arange(B * Hu * Wu)
    b, r = mo // (Hu * Wu), mo % (Hu * Wu)
    mi = b * H * W + (r // Wu // s) * W + (r % Wu) // s
    U = np.zeros((B * H * W, B * Hu * Wu), np.float32)
    U[mi, mo] = 1.0
    return U


def _conv_weight_mat(w, cin_pad):
    """(Cout,Cin,KH,KW) f32 -> (Cout, KH*KW*cin_pad) bf16, (kh,kw,cin) order."""
    cout, cin, kh, kw = w.shape
    if cin_pad != cin:
        w = jnp.pad(w, ((0, 0), (0, cin_pad - cin), (0, 0), (0, 0)))
        cin = cin_pad
    return jnp.transpose(w, (0, 2, 3, 1)).reshape(cout, kh * kw * cin).astype(jnp.bfloat16)


# ----------------------------------------------------------------------------
# Parameter init (mirrors create_modules shapes; BN folded for inference).
# ----------------------------------------------------------------------------
def init_params(blocks, key, in_channels=3):
    params = []
    in_c = in_channels
    out_channels = []
    for i, blk in enumerate(blocks):
        t = blk['type']
        if t == 'convolutional':
            cout = int(blk['filters'])
            k = int(blk['size'])
            bkey = jax.random.fold_in(key, i)
            # PyTorch Conv2d weight layout: (Cout, Cin, KH, KW)
            w = 0.1 * jax.random.normal(bkey, (cout, in_c, k, k), jnp.float32)
            if int(blk.get('batch_normalize', 0)):
                k1, k2, k3, k4 = jax.random.split(jax.random.fold_in(bkey, 1), 4)
                gamma = 1.0 + 0.1 * jax.random.normal(k1, (cout,), jnp.float32)
                beta = 0.1 * jax.random.normal(k2, (cout,), jnp.float32)
                mean = 0.1 * jax.random.normal(k3, (cout,), jnp.float32)
                var = 0.1 * jnp.abs(jax.random.normal(k4, (cout,), jnp.float32)) + 0.5
                scale = gamma / jnp.sqrt(var + 1e-5)          # folded inference BN
                bias = beta - mean * scale
            else:
                scale = jnp.ones((cout,), jnp.float32)
                bias = 0.1 * jax.random.normal(jax.random.fold_in(bkey, 2),
                                               (cout,), jnp.float32)
            params.append({'w': w * scale[:, None, None, None],   # BN scale folded
                           'bias': bias.reshape(cout, 1)})
            out_channels.append(cout)
            in_c = cout
        elif t == 'route':
            layers = [int(l) for l in blk['layers'].split(',')]
            c = sum(out_channels[l] for l in layers)
            params.append(None)
            out_channels.append(c)
            in_c = c
        elif t in ('upsample', 'shortcut'):
            params.append(None)
            out_channels.append(out_channels[-1])
        elif t == 'yolo':
            mask = [int(m) for m in blk['mask'].split(',')]
            vals = [int(v) for v in blk['anchors'].split(',')]
            anchors_all = [(vals[2 * j], vals[2 * j + 1]) for j in range(len(vals) // 2)]
            params.append({'anchors': [anchors_all[m] for m in mask]})
            out_channels.append(out_channels[-1])
        else:
            raise ValueError(t)
    return params


# ----------------------------------------------------------------------------
# Static planner + fused kernel body.  Activations live in a channels-first
# flat "CM" layout (C, B*H*W): the 128-lane axis carries M (lane-dense stores,
# full MXU columns) for every conv in the net.
# ----------------------------------------------------------------------------
def _build_fused(blocks, params, B, c_in, H0, W0):
    args = []

    def add(a):
        args.append(a)
        return len(args) - 1

    mask_cache, down_cache, up_cache = {}, {}, {}
    plan, yolo_meta, out_shapes = [], [], []
    layer_chw = {}
    H, W, C = H0, W0, c_in

    for i, blk in enumerate(blocks):
        t = blk['type']
        if t == 'convolutional':
            k = int(blk['size'])
            stride = int(blk['stride'])
            pad = (k - 1) // 2 if int(blk['pad']) else 0
            if k not in (1, 3) or pad != (k - 1) // 2:
                raise NotImplementedError('only 1x1 and same-pad 3x3 convs supported')
            leaky = blk['activation'] == 'leaky'
            cout = int(blk['filters'])
            p = params[i]
            op = {'op': 'conv', 'i': i, 'k': k, 'leaky': leaky,
                  'cin': C, 'cout': cout, 'W': W}
            if k == 3 and C % 8 != 0:
                # per-tap fallback (unused for this cfg; the net input is padded)
                w9 = jnp.transpose(p['w'], (2, 3, 0, 1)).reshape(9, cout, C)
                op['w'] = add(w9.astype(jnp.bfloat16))
                op['wmode'] = 'taps'
            else:
                op['w'] = add(_conv_weight_mat(p['w'], cin_pad=C))
                op['wmode'] = 'mat'
            op['b'] = add(p['bias'])
            if k == 3:
                mkey = (B, H, W)
                if mkey not in mask_cache:
                    mask_cache[mkey] = add(jnp.asarray(_boundary_masks(B, H, W)))
                op['mask'] = mask_cache[mkey]
            if stride != 1:
                dkey = (B, H, W, stride)
                if dkey not in down_cache:
                    down_cache[dkey] = add(jnp.asarray(
                        _downsample_matrix(B, H, W, stride), jnp.bfloat16))
                op['down'] = down_cache[dkey]
                H, W = -(-H // stride), -(-W // stride)
            plan.append(op)
            C = cout
        elif t == 'upsample':
            s = int(blk['stride'])
            ukey = (B, H, W, s)
            if ukey not in up_cache:
                up_cache[ukey] = add(jnp.asarray(_upsample_matrix(B, H, W, s),
                                                 jnp.bfloat16))
            plan.append({'op': 'upsample', 'i': i, 'up': up_cache[ukey]})
            H, W = H * s, W * s
        elif t == 'route':
            layers = [int(l) for l in blk['layers'].split(',')]
            layers = [l if l > 0 else i + l for l in layers]
            plan.append({'op': 'route', 'i': i, 'layers': layers})
            C = sum(layer_chw[l][0] for l in layers)
            _, H, W = layer_chw[layers[0]]
        elif t == 'shortcut':
            plan.append({'op': 'shortcut', 'i': i, 'frm': i + int(blk['from'])})
        elif t == 'yolo':
            plan.append({'op': 'yolo', 'i': i, 'out': len(out_shapes)})
            out_shapes.append(jax.ShapeDtypeStruct((C, B * H * W), jnp.float32))
            yolo_meta.append({'anchors': params[i]['anchors'],
                              'classes': int(blk['classes']),
                              'C': C, 'H': H, 'W': W})
        else:
            raise ValueError(t)
        layer_chw[i] = (C, H, W)

    n_in = len(args) + 1          # +1 for the activation slab (first operand)

    def kernel(*refs):
        x_ref = refs[0]
        in_refs = refs[1:n_in]
        out_refs = refs[n_in:]

        def a(idx):
            return in_refs[idx][...]

        def leaky_relu(y):
            return jnp.where(y > 0, y, 0.1 * y)

        outputs = {}
        x = x_ref[...]            # (Cpad, B*H0*W0) f32

        for op in plan:
            kind = op['op']
            if kind == 'conv':
                if op['k'] == 3:
                    masks = a(op['mask'])
                    Wd, M = op['W'], x.shape[1]
                    taps = []
                    for t_idx, (dh, dw) in enumerate(_TAP_OFFSETS):
                        off = dh * Wd + dw
                        xs = pltpu.roll(x, shift=(-off) % M, axis=1) if off else x
                        taps.append(xs * masks[t_idx:t_idx + 1, :])
                    if op['wmode'] == 'mat':
                        # one stacked (9*Cin, M) slab -> one MXU dot
                        slab = jnp.concatenate(taps, axis=0).astype(jnp.bfloat16)
                        if 'down' in op:     # stride-s: exact 0/1 lane selection
                            slab = jnp.dot(slab, a(op['down']),
                                           preferred_element_type=jnp.float32
                                           ).astype(jnp.bfloat16)
                        acc = jnp.dot(a(op['w']), slab,
                                      preferred_element_type=jnp.float32)
                    else:                    # generic fallback: 9 small dots
                        w9 = a(op['w'])
                        acc = None
                        for t_idx, tap in enumerate(taps):
                            tb = tap.astype(jnp.bfloat16)
                            if 'down' in op:
                                tb = jnp.dot(tb, a(op['down']),
                                             preferred_element_type=jnp.float32
                                             ).astype(jnp.bfloat16)
                            d = jnp.dot(w9[t_idx], tb,
                                        preferred_element_type=jnp.float32)
                            acc = d if acc is None else acc + d
                else:                        # 1x1 conv: the activation IS the slab
                    slab = x.astype(jnp.bfloat16)
                    if 'down' in op:
                        slab = jnp.dot(slab, a(op['down']),
                                       preferred_element_type=jnp.float32
                                       ).astype(jnp.bfloat16)
                    acc = jnp.dot(a(op['w']), slab,
                                  preferred_element_type=jnp.float32)
                y = acc + a(op['b'])         # (Cout,1) bias broadcasts on lanes
                if op['leaky']:
                    y = leaky_relu(y)
                x = y
                outputs[op['i']] = x
            elif kind == 'upsample':
                x = jnp.dot(x.astype(jnp.bfloat16), a(op['up']),
                            preferred_element_type=jnp.float32)
                outputs[op['i']] = x
            elif kind == 'shortcut':
                x = x + outputs[op['frm']]
                outputs[op['i']] = x
                outputs[op['i'] - 1] = x     # mirror PyTorch in-place x.add_ aliasing
            elif kind == 'route':
                parts = [outputs[l] for l in op['layers']]
                x = parts[0] if len(parts) == 1 else jnp.concatenate(parts, axis=0)
                outputs[op['i']] = x
            elif kind == 'yolo':
                out_refs[op['out']][...] = x.astype(jnp.float32)
                # (reference forward does not store yolo activations in `outputs`)

    return args, kernel, tuple(out_shapes), yolo_meta


# ----------------------------------------------------------------------------
# YOLO box decode (lightweight elementwise glue; kept in plain JAX).
# ----------------------------------------------------------------------------
def predict_transform(x_nhwc, inp_dim, anchors, num_classes):
    B, G, _, _ = x_nhwc.shape
    stride = inp_dim // G
    A = len(anchors)
    attrs = 5 + num_classes
    p = x_nhwc.reshape(B, G * G * A, attrs)

    xy = jax.nn.sigmoid(p[:, :, 0:2])
    obj = jax.nn.sigmoid(p[:, :, 4:5])
    cls = jax.nn.sigmoid(p[:, :, 5:])

    gx, gy = jnp.meshgrid(jnp.arange(G, dtype=jnp.float32),
                          jnp.arange(G, dtype=jnp.float32))     # 'xy' indexing
    offs = jnp.stack([gx.reshape(-1), gy.reshape(-1)], axis=-1)           # (G*G, 2)
    offs = jnp.repeat(offs, A, axis=0)[None]                              # (1, G*G*A, 2)
    xy = xy + offs

    anc = jnp.asarray(anchors, dtype=jnp.float32) / stride                # (A, 2)
    anc = jnp.tile(anc, (G * G, 1))[None]                                 # (1, G*G*A, 2)
    wh = jnp.exp(p[:, :, 2:4]) * anc

    return jnp.concatenate([xy * stride, wh * stride, obj, cls], axis=-1)


# ----------------------------------------------------------------------------
# Darknet forward (mirrors the PyTorch Darknet.forward control flow).
# ----------------------------------------------------------------------------
def darknet_forward(x_nchw, blocks, params):
    input_size = x_nchw.shape[-1]            # net_info['width'] = x.shape[-1]
    B, C0, H0, W0 = x_nchw.shape

    # channels-first flat "CM" layout, input channels zero-padded to a multiple
    # of 8 so the 3x3 tap-slab concat stays sublane-aligned (weights padded too)
    c_pad = -(-C0 // 8) * 8
    x_cm = jnp.transpose(x_nchw, (1, 0, 2, 3)).reshape(C0, B * H0 * W0)
    if c_pad != C0:
        x_cm = jnp.pad(x_cm, ((0, c_pad - C0), (0, 0)))

    kargs, kernel, out_shapes, yolo_meta = _build_fused(
        blocks, params, B, c_pad, H0, W0)

    # One fused pallas_call, no grid: every operand is a whole-array VMEM block
    # (total footprint << scoped VMEM on all generations).
    head_outs = pl.pallas_call(kernel, out_shape=out_shapes)(x_cm, *kargs)
    if not isinstance(head_outs, (tuple, list)):
        head_outs = (head_outs,)

    bboxes = []
    for y_cm, meta in zip(head_outs, yolo_meta):
        C, H, W = meta['C'], meta['H'], meta['W']
        y_nhwc = jnp.transpose(y_cm.reshape(C, B, H, W), (1, 2, 3, 0))
        bboxes.append(predict_transform(y_nhwc, input_size,
                                        meta['anchors'], meta['classes']))
    return jnp.concatenate(bboxes, axis=1)


# ----------------------------------------------------------------------------
if __name__ == "__main__":
    key = jax.random.PRNGKey(0)
    pkey, xkey = jax.random.split(key)
    params = init_params(BLOCKS, pkey, in_channels=int(NET_INFO['channels']))

    # Input matches the PyTorch convention: NCHW, 3 input channels.
    x = jax.random.normal(xkey, (2, 3, 16, 16), jnp.float32)

    fwd = jax.jit(lambda inp: darknet_forward(inp, BLOCKS, params))
    out = jax.block_until_ready(fwd(x))

    assert out.shape == (2, 8 * 8 * 3 + 16 * 16 * 3, 6), out.shape
    assert out.dtype == jnp.float32
    assert bool(jnp.all(jnp.isfinite(out)))
    print("KERNEL_OK")
</pallas_src>

<mosaic_0001>
module attributes {stable_mosaic.version = 11 : i64} {
  func.func @kernel(%arg0: memref<8x512xf32, #tpu.memory_space<vmem>>, %arg1: memref<8x72xbf16, #tpu.memory_space<vmem>>, %arg2: memref<8x1xf32, #tpu.memory_space<vmem>>, %arg3: memref<9x512xf32, #tpu.memory_space<vmem>>, %arg4: memref<16x72xbf16, #tpu.memory_space<vmem>>, %arg5: memref<16x1xf32, #tpu.memory_space<vmem>>, %arg6: memref<512x128xbf16, #tpu.memory_space<vmem>>, %arg7: memref<8x16xbf16, #tpu.memory_space<vmem>>, %arg8: memref<8x1xf32, #tpu.memory_space<vmem>>, %arg9: memref<16x72xbf16, #tpu.memory_space<vmem>>, %arg10: memref<16x1xf32, #tpu.memory_space<vmem>>, %arg11: memref<9x128xf32, #tpu.memory_space<vmem>>, %arg12: memref<18x16xbf16, #tpu.memory_space<vmem>>, %arg13: memref<18x1xf32, #tpu.memory_space<vmem>>, %arg14: memref<8x16xbf16, #tpu.memory_space<vmem>>, %arg15: memref<8x1xf32, #tpu.memory_space<vmem>>, %arg16: memref<128x512xbf16, #tpu.memory_space<vmem>>, %arg17: memref<18x16xbf16, #tpu.memory_space<vmem>>, %arg18: memref<18x1xf32, #tpu.memory_space<vmem>>, %arg19: memref<18x128xf32, #tpu.memory_space<vmem>>, %arg20: memref<18x512xf32, #tpu.memory_space<vmem>>) attributes {dimension_semantics = [], scalar_prefetch = 0 : i64, scratch_operands = 0 : i64, tpu.core_type = #tpu.core_type<tc>} {
    %c0 = arith.constant 0 : index
    %c0_0 = arith.constant 0 : index
    %0 = vector.load %arg0[%c0, %c0_0] : memref<8x512xf32, #tpu.memory_space<vmem>>, vector<8x512xf32>
    %c0_1 = arith.constant 0 : index
    %c0_2 = arith.constant 0 : index
    %1 = vector.load %arg3[%c0_1, %c0_2] : memref<9x512xf32, #tpu.memory_space<vmem>>, vector<9x512xf32>
    %c17_i32 = arith.constant 17 : i32
    %2 = tpu.dynamic_rotate %0 by %c17_i32 dim 1 : vector<8x512xf32>, i32 -> vector<8x512xf32>
    %3 = vector.extract_strided_slice %1 {offsets = [0, 0], sizes = [1, 512], strides = [1, 1]} : vector<9x512xf32> to vector<1x512xf32>
    %4 = vector.broadcast %3 : vector<1x512xf32> to vector<8x512xf32>
    %5 = arith.mulf %2, %4 : vector<8x512xf32>
    %c16_i32 = arith.constant 16 : i32
    %6 = tpu.dynamic_rotate %0 by %c16_i32 dim 1 : vector<8x512xf32>, i32 -> vector<8x512xf32>
    %7 = vector.extract_strided_slice %1 {offsets = [1, 0], sizes = [1, 512], strides = [1, 1]} : vector<9x512xf32> to vector<1x512xf32>
    %8 = vector.broadcast %7 : vector<1x512xf32> to vector<8x512xf32>
    %9 = arith.mulf %6, %8 : vector<8x512xf32>
    %c15_i32 = arith.constant 15 : i32
    %10 = tpu.dynamic_rotate %0 by %c15_i32 dim 1 : vector<8x512xf32>, i32 -> vector<8x512xf32>
    %11 = vector.extract_strided_slice %1 {offsets = [2, 0], sizes = [1, 512], strides = [1, 1]} : vector<9x512xf32> to vector<1x512xf32>
    %12 = vector.broadcast %11 : vector<1x512xf32> to vector<8x512xf32>
    %13 = arith.mulf %10, %12 : vector<8x512xf32>
    %c1_i32 = arith.constant 1 : i32
    %14 = tpu.dynamic_rotate %0 by %c1_i32 dim 1 : vector<8x512xf32>, i32 -> vector<8x512xf32>
    %15 = vector.extract_strided_slice %1 {offsets = [3, 0], sizes = [1, 512], strides = [1, 1]} : vector<9x512xf32> to vector<1x512xf32>
    %16 = vector.broadcast %15 : vector<1x512xf32> to vector<8x512xf32>
    %17 = arith.mulf %14, %16 : vector<8x512xf32>
    %18 = vector.extract_strided_slice %1 {offsets = [4, 0], sizes = [1, 512], strides = [1, 1]} : vector<9x512xf32> to vector<1x512xf32>
    %19 = vector.broadcast %18 : vector<1x512xf32> to vector<8x512xf32>
    %20 = arith.mulf %0, %19 : vector<8x512xf32>
    %c511_i32 = arith.constant 511 : i32
    %21 = tpu.dynamic_rotate %0 by %c511_i32 dim 1 : vector<8x512xf32>, i32 -> vector<8x512xf32>
    %22 = vector.extract_strided_slice %1 {offsets = [5, 0], sizes = [1, 512], strides = [1, 1]} : vector<9x512xf32> to vector<1x512xf32>
    %23 = vector.broadcast %22 : vector<1x512xf32> to vector<8x512xf32>
    %24 = arith.mulf %21, %23 : vector<8x512xf32>
    %c497_i32 = arith.constant 497 : i32
    %25 = tpu.dynamic_rotate %0 by %c497_i32 dim 1 : vector<8x512xf32>, i32 -> vector<8x512xf32>
    %26 = vector.extract_strided_slice %1 {offsets = [6, 0], sizes = [1, 512], strides = [1, 1]} : vector<9x512xf32> to vector<1x512xf32>
    %27 = vector.broadcast %26 : vector<1x512xf32> to vector<8x512xf32>
    %28 = arith.mulf %25, %27 : vector<8x512xf32>
    %c496_i32 = arith.constant 496 : i32
    %29 = tpu.dynamic_rotate %0 by %c496_i32 dim 1 : vector<8x512xf32>, i32 -> vector<8x512xf32>
    %30 = vector.extract_strided_slice %1 {offsets = [7, 0], sizes = [1, 512], strides = [1, 1]} : vector<9x512xf32> to vector<1x512xf32>
    %31 = vector.broadcast %30 : vector<1x512xf32> to vector<8x512xf32>
    %32 = arith.mulf %29, %31 : vector<8x512xf32>
    %c495_i32 = arith.constant 495 : i32
    %33 = tpu.dynamic_rotate %0 by %c495_i32 dim 1 : vector<8x512xf32>, i32 -> vector<8x512xf32>
    %34 = vector.extract_strided_slice %1 {offsets = [8, 0], sizes = [1, 512], strides = [1, 1]} : vector<9x512xf32> to vector<1x512xf32>
    %35 = vector.broadcast %34 : vector<1x512xf32> to vector<8x512xf32>
    %36 = arith.mulf %33, %35 : vector<8x512xf32>
    %37 = tpu.concatenate %5, %9, %13, %17, %20, %24, %28, %32, %36 in 0 : vector<8x512xf32>, vector<8x512xf32>, vector<8x512xf32>, vector<8x512xf32>, vector<8x512xf32>, vector<8x512xf32>, vector<8x512xf32>, vector<8x512xf32>, vector<8x512xf32> -> vector<72x512xf32>
    %38 = arith.truncf %37 : vector<72x512xf32> to vector<72x512xbf16>
    %c0_3 = arith.constant 0 : index
    %c0_4 = arith.constant 0 : index
    %39 = vector.load %arg1[%c0_3, %c0_4] : memref<8x72xbf16, #tpu.memory_space<vmem>>, vector<8x72xbf16>
    %cst = arith.constant dense<0.000000e+00> : vector<8x512xf32>
    %40 = tpu.matmul %39, %38, %cst {dimension_numbers = #tpu.dot_dimension_numbers<[1], [0], [0], [1], [0, 0, 1, 1], [], []>} : vector<8x72xbf16>, vector<72x512xbf16>, vector<8x512xf32> -> vector<8x512xf32>
    %c0_5 = arith.constant 0 : index
    %c0_6 = arith.constant 0 : index
    %41 = vector.load %arg2[%c0_5, %c0_6] : memref<8x1xf32, #tpu.memory_space<vmem>>, vector<8x1xf32>
    %42 = vector.broadcast %41 : vector<8x1xf32> to vector<8x512xf32>
    %43 = arith.addf %40, %42 : vector<8x512xf32>
    %cst_7 = arith.constant 0.000000e+00 : f32
    %44 = vector.broadcast %cst_7 : f32 to vector<8x512xf32>
    %45 = arith.cmpf ogt, %43, %44 : vector<8x512xf32>
    %cst_8 = arith.constant 1.000000e-01 : f32
    %46 = vector.broadcast %cst_8 : f32 to vector<8x512xf32>
    %47 = arith.mulf %46, %43 : vector<8x512xf32>
    %48 = arith.select %45, %43, %47 : vector<8x512xi1>, vector<8x512xf32>
    %c0_9 = arith.constant 0 : index
    %c0_10 = arith.constant 0 : index
    %49 = vector.load %arg3[%c0_9, %c0_10] : memref<9x512xf32, #tpu.memory_space<vmem>>, vector<9x512xf32>
    %c17_i32_11 = arith.constant 17 : i32
    %50 = tpu.dynamic_rotate %48 by %c17_i32_11 dim 1 : vector<8x512xf32>, i32 -> vector<8x512xf32>
    %51 = vector.extract_strided_slice %49 {offsets = [0, 0], sizes = [1, 512], strides = [1, 1]} : vector<9x512xf32> to vector<1x512xf32>
    %52 = vector.broadcast %51 : vector<1x512xf32> to vector<8x512xf32>
    %53 = arith.mulf %50, %52 : vector<8x512xf32>
    %c16_i32_12 = arith.constant 16 : i32
    %54 = tpu.dynamic_rotate %48 by %c16_i32_12 dim 1 : vector<8x512xf32>, i32 -> vector<8x512xf32>
    %55 = vector.extract_strided_slice %49 {offsets = [1, 0], sizes = [1, 512], strides = [1, 1]} : vector<9x512xf32> to vector<1x512xf32>
    %56 = vector.broadcast %55 : vector<1x512xf32> to vector<8x512xf32>
    %57 = arith.mulf %54, %56 : vector<8x512xf32>
    %c15_i32_13 = arith.constant 15 : i32
    %58 = tpu.dynamic_rotate %48 by %c15_i32_13 dim 1 : vector<8x512xf32>, i32 -> vector<8x512xf32>
    %59 = vector.extract_strided_slice %49 {offsets = [2, 0], sizes = [1, 512], strides = [1, 1]} : vector<9x512xf32> to vector<1x512xf32>
    %60 = vector.broadcast %59 : vector<1x512xf32> to vector<8x512xf32>
    %61 = arith.mulf %58, %60 : vector<8x512xf32>
    %c1_i32_14 = arith.constant 1 : i32
    %62 = tpu.dynamic_rotate %48 by %c1_i32_14 dim 1 : vector<8x512xf32>, i32 -> vector<8x512xf32>
    %63 = vector.extract_strided_slice %49 {offsets = [3, 0], sizes = [1, 512], strides = [1, 1]} : vector<9x512xf32> to vector<1x512xf32>
    %64 = vector.broadcast %63 : vector<1x512xf32> to vector<8x512xf32>
    %65 = arith.mulf %62, %64 : vector<8x512xf32>
    %66 = vector.extract_strided_slice %49 {offsets = [4, 0], sizes = [1, 512], strides = [1, 1]} : vector<9x512xf32> to vector<1x512xf32>
    %67 = vector.broadcast %66 : vector<1x512xf32> to vector<8x512xf32>
    %68 = arith.mulf %48, %67 : vector<8x512xf32>
    %c511_i32_15 = arith.constant 511 : i32
    %69 = tpu.dynamic_rotate %48 by %c511_i32_15 dim 1 : vector<8x512xf32>, i32 -> vector<8x512xf32>
    %70 = vector.extract_strided_slice %49 {offsets = [5, 0], sizes = [1, 512], strides = [1, 1]} : vector<9x512xf32> to vector<1x512xf32>
    %71 = vector.broadcast %70 : vector<1x512xf32> to vector<8x512xf32>
    %72 = arith.mulf %69, %71 : vector<8x512xf32>
    %c497_i32_16 = arith.constant 497 : i32
    %73 = tpu.dynamic_rotate %48 by %c497_i32_16 dim 1 : vector<8x512xf32>, i32 -> vector<8x512xf32>
    %74 = vector.extract_strided_slice %49 {offsets = [6, 0], sizes = [1, 512], strides = [1, 1]} : vector<9x512xf32> to vector<1x512xf32>
    %75 = vector.broadcast %74 : vector<1x512xf32> to vector<8x512xf32>
    %76 = arith.mulf %73, %75 : vector<8x512xf32>
    %c496_i32_17 = arith.constant 496 : i32
    %77 = tpu.dynamic_rotate %48 by %c496_i32_17 dim 1 : vector<8x512xf32>, i32 -> vector<8x512xf32>
    %78 = vector.extract_strided_slice %49 {offsets = [7, 0], sizes = [1, 512], strides = [1, 1]} : vector<9x512xf32> to vector<1x512xf32>
    %79 = vector.broadcast %78 : vector<1x512xf32> to vector<8x512xf32>
    %80 = arith.mulf %77, %79 : vector<8x512xf32>
    %c495_i32_18 = arith.constant 495 : i32
    %81 = tpu.dynamic_rotate %48 by %c495_i32_18 dim 1 : vector<8x512xf32>, i32 -> vector<8x512xf32>
    %82 = vector.extract_strided_slice %49 {offsets = [8, 0], sizes = [1, 512], strides = [1, 1]} : vector<9x512xf32> to vector<1x512xf32>
    %83 = vector.broadcast %82 : vector<1x512xf32> to vector<8x512xf32>
    %84 = arith.mulf %81, %83 : vector<8x512xf32>
    %85 = tpu.concatenate %53, %57, %61, %65, %68, %72, %76, %80, %84 in 0 : vector<8x512xf32>, vector<8x512xf32>, vector<8x512xf32>, vector<8x512xf32>, vector<8x512xf32>, vector<8x512xf32>, vector<8x512xf32>, vector<8x512xf32>, vector<8x512xf32> -> vector<72x512xf32>
    %86 = arith.truncf %85 : vector<72x512xf32> to vector<72x512xbf16>
    %c0_19 = arith.constant 0 : index
    %c0_20 = arith.constant 0 : index
    %87 = vector.load %arg6[%c0_19, %c0_20] : memref<512x128xbf16, #tpu.memory_space<vmem>>, vector<512x128xbf16>
    %cst_21 = arith.constant dense<0.000000e+00> : vector<72x128xf32>
    %88 = tpu.matmul %86, %87, %cst_21 {dimension_numbers = #tpu.dot_dimension_numbers<[1], [0], [0], [1], [0, 0, 1, 1], [], []>} : vector<72x512xbf16>, vector<512x128xbf16>, vector<72x128xf32> -> vector<72x128xf32>
    %89 = arith.truncf %88 : vector<72x128xf32> to vector<72x128xbf16>
    %c0_22 = arith.constant 0 : index
    %c0_23 = arith.constant 0 : index
    %90 = vector.load %arg4[%c0_22, %c0_23] : memref<16x72xbf16, #tpu.memory_space<vmem>>, vector<16x72xbf16>
    %cst_24 = arith.constant dense<0.000000e+00> : vector<16x128xf32>
    %91 = tpu.matmul %90, %89, %cst_24 {dimension_numbers = #tpu.dot_dimension_numbers<[1], [0], [0], [1], [0, 0, 1, 1], [], []>} : vector<16x72xbf16>, vector<72x128xbf16>, vector<16x128xf32> -> vector<16x128xf32>
    %c0_25 = arith.constant 0 : index
    %c0_26 = arith.constant 0 : index
    %92 = vector.load %arg5[%c0_25, %c0_26] : memref<16x1xf32, #tpu.memory_space<vmem>>, vector<16x1xf32>
    %93 = vector.broadcast %92 : vector<16x1xf32> to vector<16x128xf32>
    %94 = arith.addf %91, %93 : vector<16x128xf32>
    %cst_27 = arith.constant 0.000000e+00 : f32
    %95 = vector.broadcast %cst_27 : f32 to vector<16x128xf32>
    %96 = arith.cmpf ogt, %94, %95 : vector<16x128xf32>
    %cst_28 = arith.constant 1.000000e-01 : f32
    %97 = vector.broadcast %cst_28 : f32 to vector<16x128xf32>
    %98 = arith.mulf %97, %94 : vector<16x128xf32>
    %99 = arith.select %96, %94, %98 : vector<16x128xi1>, vector<16x128xf32>
    %100 = arith.truncf %99 : vector<16x128xf32> to vector<16x128xbf16>
    %c0_29 = arith.constant 0 : index
    %c0_30 = arith.constant 0 : index
    %101 = vector.load %arg7[%c0_29, %c0_30] : memref<8x16xbf16, #tpu.memory_space<vmem>>, vector<8x16xbf16>
    %cst_31 = arith.constant dense<0.000000e+00> : vector<8x128xf32>
    %102 = tpu.matmul %101, %100, %cst_31 {dimension_numbers = #tpu.dot_dimension_numbers<[1], [0], [0], [1], [0, 0, 1, 1], [], []>} : vector<8x16xbf16>, vector<16x128xbf16>, vector<8x128xf32> -> vector<8x128xf32>
    %c0_32 = arith.constant 0 : index
    %c0_33 = arith.constant 0 : index
    %103 = vector.load %arg8[%c0_32, %c0_33] : memref<8x1xf32, #tpu.memory_space<vmem>>, vector<8x1xf32>
    %104 = vector.broadcast %103 : vector<8x1xf32> to vector<8x128xf32>
    %105 = arith.addf %102, %104 : vector<8x128xf32>
    %cst_34 = arith.constant 0.000000e+00 : f32
    %106 = vector.broadcast %cst_34 : f32 to vector<8x128xf32>
    %107 = arith.cmpf ogt, %105, %106 : vector<8x128xf32>
    %cst_35 = arith.constant 1.000000e-01 : f32
    %108 = vector.broadcast %cst_35 : f32 to vector<8x128xf32>
    %109 = arith.mulf %108, %105 : vector<8x128xf32>
    %110 = arith.select %107, %105, %109 : vector<8x128xi1>, vector<8x128xf32>
    %c0_36 = arith.constant 0 : index
    %c0_37 = arith.constant 0 : index
    %111 = vector.load %arg11[%c0_36, %c0_37] : memref<9x128xf32, #tpu.memory_space<vmem>>, vector<9x128xf32>
    %c9_i32 = arith.constant 9 : i32
    %112 = tpu.dynamic_rotate %110 by %c9_i32 dim 1 : vector<8x128xf32>, i32 -> vector<8x128xf32>
    %113 = vector.extract_strided_slice %111 {offsets = [0, 0], sizes = [1, 128], strides = [1, 1]} : vector<9x128xf32> to vector<1x128xf32>
    %114 = vector.broadcast %113 : vector<1x128xf32> to vector<8x128xf32>
    %115 = arith.mulf %112, %114 : vector<8x128xf32>
    %c8_i32 = arith.constant 8 : i32
    %116 = tpu.dynamic_rotate %110 by %c8_i32 dim 1 : vector<8x128xf32>, i32 -> vector<8x128xf32>
    %117 = vector.extract_strided_slice %111 {offsets = [1, 0], sizes = [1, 128], strides = [1, 1]} : vector<9x128xf32> to vector<1x128xf32>
    %118 = vector.broadcast %117 : vector<1x128xf32> to vector<8x128xf32>
    %119 = arith.mulf %116, %118 : vector<8x128xf32>
    %c7_i32 = arith.constant 7 : i32
    %120 = tpu.dynamic_rotate %110 by %c7_i32 dim 1 : vector<8x128xf32>, i32 -> vector<8x128xf32>
    %121 = vector.extract_strided_slice %111 {offsets = [2, 0], sizes = [1, 128], strides = [1, 1]} : vector<9x128xf32> to vector<1x128xf32>
    %122 = vector.broadcast %121 : vector<1x128xf32> to vector<8x128xf32>
    %123 = arith.mulf %120, %122 : vector<8x128xf32>
    %c1_i32_38 = arith.constant 1 : i32
    %124 = tpu.dynamic_rotate %110 by %c1_i32_38 dim 1 : vector<8x128xf32>, i32 -> vector<8x128xf32>
    %125 = vector.extract_strided_slice %111 {offsets = [3, 0], sizes = [1, 128], strides = [1, 1]} : vector<9x128xf32> to vector<1x128xf32>
    %126 = vector.broadcast %125 : vector<1x128xf32> to vector<8x128xf32>
    %127 = arith.mulf %124, %126 : vector<8x128xf32>
    %128 = vector.extract_strided_slice %111 {offsets = [4, 0], sizes = [1, 128], strides = [1, 1]} : vector<9x128xf32> to vector<1x128xf32>
    %129 = vector.broadcast %128 : vector<1x128xf32> to vector<8x128xf32>
    %130 = arith.mulf %110, %129 : vector<8x128xf32>
    %c127_i32 = arith.constant 127 : i32
    %131 = tpu.dynamic_rotate %110 by %c127_i32 dim 1 : vector<8x128xf32>, i32 -> vector<8x128xf32>
    %132 = vector.extract_strided_slice %111 {offsets = [5, 0], sizes = [1, 128], strides = [1, 1]} : vector<9x128xf32> to vector<1x128xf32>
    %133 = vector.broadcast %132 : vector<1x128xf32> to vector<8x128xf32>
    %134 = arith.mulf %131, %133 : vector<8x128xf32>
    %c121_i32 = arith.constant 121 : i32
    %135 = tpu.dynamic_rotate %110 by %c121_i32 dim 1 : vector<8x128xf32>, i32 -> vector<8x128xf32>
    %136 = vector.extract_strided_slice %111 {offsets = [6, 0], sizes = [1, 128], strides = [1, 1]} : vector<9x128xf32> to vector<1x128xf32>
    %137 = vector.broadcast %136 : vector<1x128xf32> to vector<8x128xf32>
    %138 = arith.mulf %135, %137 : vector<8x128xf32>
    %c120_i32 = arith.constant 120 : i32
    %139 = tpu.dynamic_rotate %110 by %c120_i32 dim 1 : vector<8x128xf32>, i32 -> vector<8x128xf32>
    %140 = vector.extract_strided_slice %111 {offsets = [7, 0], sizes = [1, 128], strides = [1, 1]} : vector<9x128xf32> to vector<1x128xf32>
    %141 = vector.broadcast %140 : vector<1x128xf32> to vector<8x128xf32>
    %142 = arith.mulf %139, %141 : vector<8x128xf32>
    %c119_i32 = arith.constant 119 : i32
    %143 = tpu.dynamic_rotate %110 by %c119_i32 dim 1 : vector<8x128xf32>, i32 -> vector<8x128xf32>
    %144 = vector.extract_strided_slice %111 {offsets = [8, 0], sizes = [1, 128], strides = [1, 1]} : vector<9x128xf32> to vector<1x128xf32>
    %145 = vector.broadcast %144 : vector<1x128xf32> to vector<8x128xf32>
    %146 = arith.mulf %143, %145 : vector<8x128xf32>
    %147 = tpu.concatenate %115, %119, %123, %127, %130, %134, %138, %142, %146 in 0 : vector<8x128xf32>, vector<8x128xf32>, vector<8x128xf32>, vector<8x128xf32>, vector<8x128xf32>, vector<8x128xf32>, vector<8x128xf32>, vector<8x128xf32>, vector<8x128xf32> -> vector<72x128xf32>
    %148 = arith.truncf %147 : vector<72x128xf32> to vector<72x128xbf16>
    %c0_39 = arith.constant 0 : index
    %c0_40 = arith.constant 0 : index
    %149 = vector.load %arg9[%c0_39, %c0_40] : memref<16x72xbf16, #tpu.memory_space<vmem>>, vector<16x72xbf16>
    %cst_41 = arith.constant dense<0.000000e+00> : vector<16x128xf32>
    %150 = tpu.matmul %149, %148, %cst_41 {dimension_numbers = #tpu.dot_dimension_numbers<[1], [0], [0], [1], [0, 0, 1, 1], [], []>} : vector<16x72xbf16>, vector<72x128xbf16>, vector<16x128xf32> -> vector<16x128xf32>
    %c0_42 = arith.constant 0 : index
    %c0_43 = arith.constant 0 : index
    %151 = vector.load %arg10[%c0_42, %c0_43] : memref<16x1xf32, #tpu.memory_space<vmem>>, vector<16x1xf32>
    %152 = vector.broadcast %151 : vector<16x1xf32> to vector<16x128xf32>
    %153 = arith.addf %150, %152 : vector<16x128xf32>
    %cst_44 = arith.constant 0.000000e+00 : f32
    %154 = vector.broadcast %cst_44 : f32 to vector<16x128xf32>
    %155 = arith.cmpf ogt, %153, %154 : vector<16x128xf32>
    %cst_45 = arith.constant 1.000000e-01 : f32
    %156 = vector.broadcast %cst_45 : f32 to vector<16x128xf32>
    %157 = arith.mulf %156, %153 : vector<16x128xf32>
    %158 = arith.select %155, %153, %157 : vector<16x128xi1>, vector<16x128xf32>
    %159 = arith.addf %158, %99 : vector<16x128xf32>
    %160 = arith.truncf %159 : vector<16x128xf32> to vector<16x128xbf16>
    %c0_46 = arith.constant 0 : index
    %c0_47 = arith.constant 0 : index
    %161 = vector.load %arg12[%c0_46, %c0_47] : memref<18x16xbf16, #tpu.memory_space<vmem>>, vector<18x16xbf16>
    %cst_48 = arith.constant dense<0.000000e+00> : vector<18x128xf32>
    %162 = tpu.matmul %161, %160, %cst_48 {dimension_numbers = #tpu.dot_dimension_numbers<[1], [0], [0], [1], [0, 0, 1, 1], [], []>} : vector<18x16xbf16>, vector<16x128xbf16>, vector<18x128xf32> -> vector<18x128xf32>
    %c0_49 = arith.constant 0 : index
    %c0_50 = arith.constant 0 : index
    %163 = vector.load %arg13[%c0_49, %c0_50] : memref<18x1xf32, #tpu.memory_space<vmem>>, vector<18x1xf32>
    %164 = vector.broadcast %163 : vector<18x1xf32> to vector<18x128xf32>
    %165 = arith.addf %162, %164 : vector<18x128xf32>
    %c0_51 = arith.constant 0 : index
    %c0_52 = arith.constant 0 : index
    %166 = vector.load %arg19[%c0_51, %c0_52] : memref<18x128xf32, #tpu.memory_space<vmem>>, vector<18x128xf32>
    tpu.vector_store %arg19[%c0_51, %c0_52], %165 {strides = array<i32>} : memref<18x128xf32, #tpu.memory_space<vmem>>, vector<18x128xf32>,
    %167 = arith.truncf %159 : vector<16x128xf32> to vector<16x128xbf16>
    %c0_53 = arith.constant 0 : index
    %c0_54 = arith.constant 0 : index
    %168 = vector.load %arg14[%c0_53, %c0_54] : memref<8x16xbf16, #tpu.memory_space<vmem>>, vector<8x16xbf16>
    %cst_55 = arith.constant dense<0.000000e+00> : vector<8x128xf32>
    %169 = tpu.matmul %168, %167, %cst_55 {dimension_numbers = #tpu.dot_dimension_numbers<[1], [0], [0], [1], [0, 0, 1, 1], [], []>} : vector<8x16xbf16>, vector<16x128xbf16>, vector<8x128xf32> -> vector<8x128xf32>
    %c0_56 = arith.constant 0 : index
    %c0_57 = arith.constant 0 : index
    %170 = vector.load %arg15[%c0_56, %c0_57] : memref<8x1xf32, #tpu.memory_space<vmem>>, vector<8x1xf32>
    %171 = vector.broadcast %170 : vector<8x1xf32> to vector<8x128xf32>
    %172 = arith.addf %169, %171 : vector<8x128xf32>
    %cst_58 = arith.constant 0.000000e+00 : f32
    %173 = vector.broadcast %cst_58 : f32 to vector<8x128xf32>
    %174 = arith.cmpf ogt, %172, %173 : vector<8x128xf32>
    %cst_59 = arith.constant 1.000000e-01 : f32
    %175 = vector.broadcast %cst_59 : f32 to vector<8x128xf32>
    %176 = arith.mulf %175, %172 : vector<8x128xf32>
    %177 = arith.select %174, %172, %176 : vector<8x128xi1>, vector<8x128xf32>
    %178 = arith.truncf %177 : vector<8x128xf32> to vector<8x128xbf16>
    %c0_60 = arith.constant 0 : index
    %c0_61 = arith.constant 0 : index
    %179 = vector.load %arg16[%c0_60, %c0_61] : memref<128x512xbf16, #tpu.memory_space<vmem>>, vector<128x512xbf16>
    %cst_62 = arith.constant dense<0.000000e+00> : vector<8x512xf32>
    %180 = tpu.matmul %178, %179, %cst_62 {dimension_numbers = #tpu.dot_dimension_numbers<[1], [0], [0], [1], [0, 0, 1, 1], [], []>} : vector<8x128xbf16>, vector<128x512xbf16>, vector<8x512xf32> -> vector<8x512xf32>
    %181 = tpu.concatenate %180, %48 in 0 : vector<8x512xf32>, vector<8x512xf32> -> vector<16x512xf32>
    %182 = arith.truncf %181 : vector<16x512xf32> to vector<16x512xbf16>
    %c0_63 = arith.constant 0 : index
    %c0_64 = arith.constant 0 : index
    %183 = vector.load %arg17[%c0_63, %c0_64] : memref<18x16xbf16, #tpu.memory_space<vmem>>, vector<18x16xbf16>
    %cst_65 = arith.constant dense<0.000000e+00> : vector<18x512xf32>
    %184 = tpu.matmul %183, %182, %cst_65 {dimension_numbers = #tpu.dot_dimension_numbers<[1], [0], [0], [1], [0, 0, 1, 1], [], []>} : vector<18x16xbf16>, vector<16x512xbf16>, vector<18x512xf32> -> vector<18x512xf32>
    %c0_66 = arith.constant 0 : index
    %c0_67 = arith.constant 0 : index
    %185 = vector.load %arg18[%c0_66, %c0_67] : memref<18x1xf32, #tpu.memory_space<vmem>>, vector<18x1xf32>
    %186 = vector.broadcast %185 : vector<18x1xf32> to vector<18x512xf32>
    %187 = arith.addf %184, %186 : vector<18x512xf32>
    %c0_68 = arith.constant 0 : index
    %c0_69 = arith.constant 0 : index
    %188 = vector.load %arg20[%c0_68, %c0_69] : memref<18x512xf32, #tpu.memory_space<vmem>>, vector<18x512xf32>
    tpu.vector_store %arg20[%c0_68, %c0_69], %187 {strides = array<i32>} : memref<18x512xf32, #tpu.memory_space<vmem>>, vector<18x512xf32>,
    return
  }
}

</mosaic_0001>

<bundles_post_ra>
// kernel: _lambda_.1
= control target key start
LH: loop header
LB: loop body
LE: loop exit
PB: predicated region body
PF: predicated region fallthrough
CT: control target
= control target key end

     0   :  { %s2254_s25 = smov 17   ;;  %s2256_s29 = smov 15   ;;  %v3355_v4 = vmov 0   ;;  %v85_v6 = vlaneseq  ;;  %vm394_vm8 = vcmask 1043456   ;;  %vm390_vm9 = vcmask 588800   ;;  %s3323_s0 = inlined_call_operand.vmem [shape: f32[8,512], index: 0, kind: input, shape index: {}]   ;;  %s3324_s2 = inlined_call_operand.vmem [shape: f32[8,1], index: 2, kind: input, shape index: {}]   ;;  %s3325_s3 = inlined_call_operand.vmem [shape: f32[9,512], index: 3, kind: input, shape index: {}]   ;;  %s3326_s1 = inlined_call_operand.vmem [shape: bf16[8,72], index: 1, kind: input, shape index: {}]   ;;  %s3327_s6 = inlined_call_operand.vmem [shape: bf16[512,128], index: 6, kind: input, shape index: {}]   ;;  %s3328_s5 = inlined_call_operand.vmem [shape: f32[16,1], index: 5, kind: input, shape index: {}]   ;;  %s3329_s8 = inlined_call_operand.vmem [shape: f32[8,1], index: 8, kind: input, shape index: {}]   ;;  %s3330_s4 = inlined_call_operand.vmem [shape: bf16[16,72], index: 4, kind: input, shape index: {}]   ;;  %s3331_s7 = inlined_call_operand.vmem [shape: bf16[8,16], index: 7, kind: input, shape index: {}]   ;;  %s3332_s9 = inlined_call_operand.vmem [shape: bf16[16,72], index: 9, kind: input, shape index: {}]   ;;  %s3333_s10 = inlined_call_operand.vmem [shape: f32[16,1], index: 10, kind: input, shape index: {}]   ;;  %s3334_s13 = inlined_call_operand.vmem [shape: f32[18,1], index: 13, kind: input, shape index: {}]   ;;  %s3335_s15 = inlined_call_operand.vmem [shape: f32[8,1], index: 15, kind: input, shape index: {}]   ;;  %s3336_s18 = inlined_call_operand.vmem [shape: f32[18,1], index: 18, kind: input, shape index: {}]   ;;  %s3337_s11 = inlined_call_operand.vmem [shape: f32[9,128], index: 11, kind: input, shape index: {}]   ;;  %s3338_s12 = inlined_call_operand.vmem [shape: bf16[18,16], index: 12, kind: input, shape index: {}]   ;;  %s3339_s16 = inlined_call_operand.vmem [shape: bf16[128,512], index: 16, kind: input, shape index: {}]   ;;  %s3340_s14 = inlined_call_operand.vmem [shape: bf16[8,16], index: 14, kind: input, shape index: {}]   ;;  %s3341_s19 = inlined_call_operand.vmem [shape: f32[18,128], index: 19, kind: output, shape index: {0}]   ;;  %s3342_s17 = inlined_call_operand.vmem [shape: bf16[18,16], index: 17, kind: input, shape index: {}]   ;;  %s3343_s20 = inlined_call_operand.vmem [shape: f32[18,512], index: 20, kind: output, shape index: {1}]  }
   0x1   :  { %3362 = sst [smem:[#allocation7_spill]] %s3323_s0  ;;  %s2257_s30 = smov 1   ;;  %439 = vmatprep.mubr.bf16.mxu0 %v3355_v4  ;;  %480 = vmatprep.mubr.bf16.mxu1 %v3355_v4  ;;  %vm2264_vm14 = vmmov 0  }
   0x2   :  { %3363 = sst [smem:[#allocation8_spill]] %s3324_s2  ;;  %s3367_s23 = sld [smem:[#allocation7_spill]]  ;;  %2166 = vset.pattern.permute.xlu0 %v3355_v4  ;;  %2167 = vset.pattern.permute.xlu1 %v3355_v4  ;;  %v2467_v7 = vshrl.u32 %v85_v6, 7  ;;  %v2469_v10 = vand.u32 127, %v85_v6 }
   0x3   :  { %3364 = sst [smem:[#allocation9_spill]] %s3325_s3  ;;  %s3353_s0 = smov 127  }
   0x4   :  { %3365 = sst [smem:[#allocation10_spill]] %s3326_s1  ;;  %s3351_s21 = smov 113   ;;  %v2472_v11 = vsub.s32 0, %v2467_v7  ;;  %v2475_v12 = vsub.s32 1, %v2467_v7  ;;  %vm87_vm0 = vcmp.lt.s32.totalorder %v2469_v10, 17  ;;  %vm120_vm1 = vcmp.lt.s32.totalorder %v2469_v10, 16 }
   0x5   :  { %3366 = sst [smem:[#allocation11_spill]] %s3327_s6  ;;  %s2255_s6 = smov 16   ;;  %v2556_v53 = vsub.s32 2, %v2467_v7  ;;  %v2559_v54 = vsub.s32 3, %v2467_v7  ;;  %vm153_vm2 = vcmp.lt.s32.totalorder %v2469_v10, 15  ;;  %vm186_vm3 = vcmp.lt.s32.totalorder %v2469_v10, 1 }
   0x6   :  { %s3349_s2 = smov 112   ;;  %s3347_s22 = smov 111   ;;  %vm239_vm4 = vcmp.lt.s32.totalorder %v2469_v10, 127  ;;  %vm305_vm5 = vcmp.lt.s32.totalorder %v2469_v10, 112  ;;  %vm272_vm6 = vcmp.lt.s32.totalorder %v2469_v10, 113  ;;  %vm338_vm7 = vcmp.lt.s32.totalorder %v2469_v10, 111 }
   0x7   :  { %s3368_s3 = sld [smem:[#allocation8_spill]]  ;;  %s3369_s27 = sld [smem:[#allocation9_spill]]  ;;  %3370 = vst [vmem:[#allocation2_spill] sm:$0xff] %v2556_v53  ;;  %v1061_v10 = vld [vmem:[%s3328_s5 + $0x8] sm:$0xff] }
   0x8   :  { %v2379_v0 = vld [vmem:[%s3367_s23 + $0x10] sm:$0xff]  ;;  %v2384_v1 = vld [vmem:[%s3367_s23] sm:$0xff]  ;;  %v2393_v2 = vld [vmem:[%s3367_s23 + $0x18] sm:$0xff]  ;;  %s3376_s28 = sld [smem:[#allocation11_spill]]  ;;  %s2265_s26 = smov 8  }
   0x9   :  { %81 = vrot.lane.b32.xlu1 %v2379_v0, %s2254_s25  ;;  %77 = vrot.lane.b32.xlu0 %v2384_v1, %s2254_s25  ;;  %v2398_v3 = vld [vmem:[%s3367_s23 + $0x8] sm:$0xff]  ;;  %s2267_s23 = smov 7  }
   0xd   :  { %83 = vrot.lane.b32.xlu1 %v2393_v2, %s2254_s25  ;;  %79 = vrot.lane.b32.xlu0 %v2398_v3, %s2254_s25  ;;  %v384_v5 = vld [vmem:[%s3368_s3] sm:$0xff]  ;;  %v2480_v13 = vld [vmem:[%s3369_s27 + $0x8] sm:$0xff]  ;;  %s3375_s3 = sld [smem:[#allocation10_spill]] }
   0xe   :  { %v2486_v16 = vld [vmem:[%s3369_s27] sm:$0xff]  ;;  %v2491_v17 = vld [vmem:[%s3369_s27 + $0x10] sm:$0xff]  ;;  %v2496_v18 = vrot.slane %v2480_v13, %v2472_v11  ;;  %v2500_v19 = vrot.slane %v2480_v13, %v2475_v12  ;;  %v2505_v20 = vld [vmem:[%s3369_s27 + $0x18] sm:$0xff]  ;;  %v2564_v57 = vrot.slane %v2480_v13, %v2556_v53  ;;  %v2569_v58 = vrot.slane %v2480_v13, %v2559_v54 }
   0xf   :  { %v2511_v22 = vrot.slane %v2486_v16, %v2472_v11  ;;  %v2515_v23 = vrot.slane %v2491_v17, %v2472_v11  ;;  %v2519_v26 = vrot.slane %v2486_v16, %v2475_v12  ;;  %v2527_v29 = vrot.slane %v2491_v17, %v2475_v12 }
  0x10   :  { %v2531_v30 = vrot.slane %v2505_v20, %v2472_v11  ;;  %v2539_v34 = vrot.slane %v2505_v20, %v2475_v12  ;;  %v2575_v60 = vrot.slane %v2486_v16, %v2556_v53  ;;  %v2579_v61 = vrot.slane %v2491_v17, %v2556_v53 }
  0x11   :  { %114 = vrot.lane.b32.xlu1 %v2398_v3, %s2255_s6  ;;  %112 = vrot.lane.b32.xlu0 %v2384_v1, %s2255_s6  ;;  %v2583_v62 = vrot.slane %v2505_v20, %v2556_v53 }
  0x15   :  { %118 = vrot.lane.b32.xlu1 %v2393_v2, %s2255_s6  ;;  %116 = vrot.lane.b32.xlu0 %v2379_v0, %s2255_s6 }
  0x19   :  { %147 = vrot.lane.b32.xlu1 %v2398_v3, %s2256_s29  ;;  %145 = vrot.lane.b32.xlu0 %v2384_v1, %s2256_s29 }
  0x1d   :  { %151 = vrot.lane.b32.xlu1 %v2393_v2, %s2256_s29  ;;  %149 = vrot.lane.b32.xlu0 %v2379_v0, %s2256_s29 }
  0x21   :  { %180 = vrot.lane.b32.xlu1 %v2398_v3, %s2257_s30  ;;  %178 = vrot.lane.b32.xlu0 %v2384_v1, %s2257_s30 }
  0x25   :  { %184 = vrot.lane.b32.xlu1 %v2393_v2, %s2257_s30  ;;  %182 = vrot.lane.b32.xlu0 %v2379_v0, %s2257_s30 }
  0x29   :  { %233 = vrot.lane.b32.xlu1 %v2398_v3, %s3353_s0  ;;  %231 = vrot.lane.b32.xlu0 %v2384_v1, %s3353_s0 }
  0x2d   :  { %237 = vrot.lane.b32.xlu1 %v2393_v2, %s3353_s0  ;;  %235 = vrot.lane.b32.xlu0 %v2379_v0, %s3353_s0 }
  0x31   :  { %266 = vrot.lane.b32.xlu1 %v2398_v3, %s3351_s21  ;;  %264 = vrot.lane.b32.xlu0 %v2384_v1, %s3351_s21 }
  0x35   :  { %270 = vrot.lane.b32.xlu1 %v2393_v2, %s3351_s21  ;;  %268 = vrot.lane.b32.xlu0 %v2379_v0, %s3351_s21 }
  0x39   :  { %299 = vrot.lane.b32.xlu1 %v2398_v3, %s3349_s2  ;;  %297 = vrot.lane.b32.xlu0 %v2384_v1, %s3349_s2 }
  0x3d   :  { %303 = vrot.lane.b32.xlu1 %v2393_v2, %s3349_s2  ;;  %301 = vrot.lane.b32.xlu0 %v2379_v0, %s3349_s2 }
  0x41   :  { %332 = vrot.lane.b32.xlu1 %v2398_v3, %s3347_s22  ;;  %330 = vrot.lane.b32.xlu0 %v2384_v1, %s3347_s22 }
  0x45   :  { %336 = vrot.lane.b32.xlu1 %v2393_v2, %s3347_s22  ;;  %334 = vrot.lane.b32.xlu0 %v2379_v0, %s3347_s22  ;;  %s2266_s22 = smov 9  }
  0x49   :  { %387 = vperm.xlu0 %2166, %v384_v5  }
  0x7b   :  { %v82_v8 = vpop.permute.xlu1 %81  ;;  %v78_v9 = vpop.permute.xlu0 %77 }
  0x7f   :  { %v84_v14 = vpop.permute.xlu1 %83  ;;  %v80_v15 = vpop.permute.xlu0 %79 }
  0x80   :  { %v90_v21 = vsel %vm87_vm0, %v78_v9, %v80_v15  ;;  %v91_v27 = vsel %vm87_vm0, %v84_v14, %v78_v9  ;;  %v89_v31 = vsel %vm87_vm0, %v80_v15, %v82_v8  ;;  %v88_v35 = vsel %vm87_vm0, %v82_v8, %v84_v14 }
  0x81   :  { %v109_v32 = vmul.f32 %v2496_v18, %v90_v21  ;;  %v108_v36 = vmul.f32 %v2511_v22, %v91_v27  ;;  %v110_v40 = vmul.f32 %v2515_v23, %v89_v31  ;;  %v111_v46 = vmul.f32 %v2531_v30, %v88_v35 }
  0x82   :  { %v2591_v9 = vrot.slane %v2486_v16, %v2559_v54  ;;  %v2595_v14 = vrot.slane %v2491_v17, %v2559_v54 }
  0x83   :  { %v115_v24 = vpop.permute.xlu1 %114  ;;  %v113_v25 = vpop.permute.xlu0 %112 }
  0x84   :  { %v123_v28 = vsel %vm120_vm1, %v113_v25, %v115_v24 }
  0x85   :  { %v142_v33 = vmul.f32 %v2500_v19, %v123_v28  ;;  %v2608_v28 = vsub.s32 4, %v2467_v7 }
  0x87   :  { %v119_v37 = vpop.permute.xlu1 %118  ;;  %v117_v38 = vpop.permute.xlu0 %116  ;;  %v364_v39 = vpack.c.bf16 %v142_v33, %v109_v32  ;;  %3371 = vst [vmem:[#allocation3_spill] sm:$0xff] %v2608_v28 }
  0x88   :  { %v124_v41 = vsel %vm120_vm1, %v119_v37, %v113_v25  ;;  %v121_v42 = vsel %vm120_vm1, %v117_v38, %v119_v37  ;;  %v122_v43 = vsel %vm120_vm1, %v115_v24, %v117_v38  ;;  %v2603_v25 = vrot.slane %v2505_v20, %v2559_v54 }
  0x89   :  { %v141_v44 = vmul.f32 %v2519_v26, %v124_v41  ;;  %v143_v45 = vmul.f32 %v2527_v29, %v122_v43  ;;  %407 = vmatprep.subr.bf16.mxu0 %v364_v39  ;;  %v144_v47 = vmul.f32 %v2539_v34, %v121_v42 }
  0x8b   :  { %v148_v48 = vpop.permute.xlu1 %147  ;;  %v146_v49 = vpop.permute.xlu0 %145  ;;  %v363_v50 = vpack.c.bf16 %v141_v44, %v108_v36  ;;  %v366_v51 = vpack.c.bf16 %v144_v47, %v111_v46  ;;  %v365_v52 = vpack.c.bf16 %v143_v45, %v110_v40  ;;  %v2612_v36 = vsub.s32 5, %v2467_v7 }
  0x8c   :  { %v156_v59 = vsel %vm153_vm2, %v146_v49, %v148_v48  ;;  %v2628_v45 = vrot.slane %v2480_v13, %v2608_v28  ;;  %v2632_v46 = vrot.slane %v2505_v20, %v2608_v28  ;;  %v2636_v47 = vrot.slane %v2486_v16, %v2608_v28 }
  0x8d   :  { %408 = vmatpush1.bf16.msra.mxu0 %v363_v50  ;;  %448 = vmatprep.subr.bf16.mxu1 %v366_v51  ;;  %v175_v15 = vmul.f32 %v2564_v57, %v156_v59  ;;  %3372 = vst [vmem:[#allocation4_spill] sm:$0xff] %v2612_v36  ;;  %v2648_v59 = vrot.slane %v2505_v20, %v2612_v36 }
  0x8e   :  { %449 = vmatpush1.bf16.msra.mxu1 %v365_v52 }
  0x8f   :  { %v152_v55 = vpop.permute.xlu1 %151  ;;  %v150_v56 = vpop.permute.xlu0 %149 }
  0x90   :  { %v157_v6 = vsel %vm153_vm2, %v152_v55, %v146_v49  ;;  %v155_v21 = vsel %vm153_vm2, %v148_v48, %v150_v56  ;;  %v154_v27 = vsel %vm153_vm2, %v150_v56, %v152_v55  ;;  %v2640_v55 = vrot.slane %v2491_v17, %v2608_v28 }
  0x91   :  { %v174_v31 = vmul.f32 %v2575_v60, %v157_v6  ;;  %v176_v37 = vmul.f32 %v2579_v61, %v155_v21  ;;  %v177_v41 = vmul.f32 %v2583_v62, %v154_v27  ;;  %v2644_v56 = vrot.slane %v2486_v16, %v2612_v36 }
  0x92   :  { %v2658_v6 = vrot.slane %v2491_v17, %v2612_v36  ;;  %v228_v21 = vmul.f32 %v2628_v45, %v2398_v3  ;;  %v227_v27 = vmul.f32 %v2636_v47, %v2384_v1 }
  0x93   :  { %v181_v63 = vpop.permute.xlu1 %180  ;;  %v179_v5 = vpop.permute.xlu0 %178 }
  0x94   :  { %v189_v8 = vsel %vm186_vm3, %v179_v5, %v181_v63 }
  0x95   :  { %v208_v24 = vmul.f32 %v2569_v58, %v189_v8 }
  0x97   :  { %v185_v32 = vpop.permute.xlu1 %184  ;;  %v183_v33 = vpop.permute.xlu0 %182  ;;  %v368_v35 = vpack.c.bf16 %v208_v24, %v175_v15  ;;  %v230_v24 = vmul.f32 %v2632_v46, %v2393_v2 }
  0x98   :  { %v190_v38 = vsel %vm186_vm3, %v185_v32, %v179_v5  ;;  %v187_v39 = vsel %vm186_vm3, %v183_v33, %v185_v32  ;;  %v188_v40 = vsel %vm186_vm3, %v181_v63, %v183_v33  ;;  %v2654_v5 = vrot.slane %v2480_v13, %v2612_v36 }
  0x99   :  { %v207_v42 = vmul.f32 %v2591_v9, %v190_v38  ;;  %v209_v43 = vmul.f32 %v2595_v14, %v188_v40  ;;  %v210_v44 = vmul.f32 %v2603_v25, %v187_v39  ;;  %409 = vmatprep.subr.bf16.mxu0 %v368_v35 }
  0x9b   :  { %v234_v48 = vpop.permute.xlu1 %233  ;;  %v232_v49 = vpop.permute.xlu0 %231  ;;  %v367_v50 = vpack.c.bf16 %v207_v42, %v174_v31  ;;  %v370_v51 = vpack.c.bf16 %v210_v44, %v177_v41  ;;  %v369_v52 = vpack.c.bf16 %v209_v43, %v176_v37  ;;  %v229_v31 = vmul.f32 %v2640_v55, %v2379_v0 }
  0x9c   :  { %v242_v63 = vsel %vm239_vm4, %v232_v49, %v234_v48 }
  0x9d   :  { %410 = vmatpush1.bf16.msra.mxu0 %v367_v50  ;;  %450 = vmatprep.subr.bf16.mxu1 %v370_v51  ;;  %v260_v32 = vmul.f32 %v2644_v56, %v242_v63 }
  0x9e   :  { %451 = vmatpush1.bf16.msra.mxu1 %v369_v52 }
  0x9f   :  { %v238_v8 = vpop.permute.xlu1 %237  ;;  %v236_v15 = vpop.permute.xlu0 %235  ;;  %v371_v42 = vpack.c.bf16 %v260_v32, %v227_v27 }
  0xa0   :  { %v243_v33 = vsel %vm239_vm4, %v238_v8, %v232_v49  ;;  %v240_v35 = vsel %vm239_vm4, %v236_v15, %v238_v8  ;;  %v241_v3 = vsel %vm239_vm4, %v234_v48, %v236_v15  ;;  %v2679_v48 = vsub.s32 7, %v2467_v7 }
  0xa1   :  { %v263_v37 = vmul.f32 %v2648_v59, %v243_v33  ;;  %v261_v2 = vmul.f32 %v2654_v5, %v241_v3  ;;  %v262_v1 = vmul.f32 %v2658_v6, %v240_v35  ;;  %v2682_v49 = vsub.s32 6, %v2467_v7 }
  0xa2   :  { %3373 = vst [vmem:[#allocation5_spill] sm:$0xff] %v2679_v48  ;;  %v2710_v27 = vrot.slane %v2505_v20, %v2679_v48  ;;  %v2718_v32 = vrot.slane %v2491_v17, %v2679_v48 }
  0xa3   :  { %v267_v38 = vpop.permute.xlu1 %266  ;;  %v265_v39 = vpop.permute.xlu0 %264  ;;  %v372_v0 = vpack.c.bf16 %v261_v2, %v228_v21  ;;  %v374_v40 = vpack.c.bf16 %v263_v37, %v230_v24  ;;  %v373_v41 = vpack.c.bf16 %v262_v1, %v229_v31  ;;  %3374 = vst [vmem:[#allocation6_spill] sm:$0xff] %v2682_v49  ;;  %v2688_v50 = vrot.slane %v2505_v20, %v2682_v49 }
  0xa4   :  { %v2692_v51 = vrot.slane %v2480_v13, %v2682_v49  ;;  %v2698_v7 = vrot.slane %v2491_v17, %v2682_v49  ;;  %v2704_v21 = vrot.slane %v2486_v16, %v2679_v48  ;;  %v2714_v31 = vrot.slane %v2480_v13, %v2679_v48 }
  0xa5   :  { %411 = vmatprep.subr.bf16.mxu0 %v372_v0  ;;  %452 = vmatprep.subr.bf16.mxu1 %v374_v40  ;;  %v2722_v33 = vrot.slane %v2486_v16, %v2682_v49  ;;  %v275_v3 = vsel %vm272_vm6, %v265_v39, %v267_v38 }
  0xa6   :  { %412 = vmatpush1.bf16.msra.mxu0 %v371_v42  ;;  %453 = vmatpush1.bf16.msra.mxu1 %v373_v41 }
  0xa7   :  { %v271_v43 = vpop.permute.xlu1 %270  ;;  %v269_v44 = vpop.permute.xlu0 %268  ;;  %v293_v42 = vmul.f32 %v2722_v33, %v275_v3  ;;  %v2754_v3 = vld [vmem:[%s3369_s27 + $0x38] ss:$0 sm:$0xff] }
  0xa8   :  { %v276_v8 = vsel %vm272_vm6, %v271_v43, %v265_v39  ;;  %v274_v15 = vsel %vm272_vm6, %v267_v38, %v269_v44  ;;  %v273_v35 = vsel %vm272_vm6, %v269_v44, %v271_v43  ;;  %v2746_v43 = vld [vmem:[%s3369_s27 + $0x20] ss:$0 sm:$0xff] }
  0xa9   :  { %v296_v20 = vmul.f32 %v2688_v50, %v276_v8  ;;  %v294_v37 = vmul.f32 %v2692_v51, %v274_v15  ;;  %v295_v38 = vmul.f32 %v2698_v7, %v273_v35 }
  0xab   :  { %v300_v52 = vpop.permute.xlu1 %299  ;;  %v298_v63 = vpop.permute.xlu0 %297 }
  0xac   :  { %v308_v24 = vsel %vm305_vm5, %v298_v63, %v300_v52 }
  0xad   :  { %v326_v17 = vmul.f32 %v2704_v21, %v308_v24 }
  0xaf   :  { %v304_v13 = vpop.permute.xlu1 %303  ;;  %v302_v2 = vpop.permute.xlu0 %301  ;;  %v375_v35 = vpack.c.bf16 %v326_v17, %v293_v42 }
  0xb0   :  { %v309_v16 = vsel %vm305_vm5, %v304_v13, %v298_v63  ;;  %v306_v1 = vsel %vm305_vm5, %v302_v2, %v304_v13  ;;  %v307_v0 = vsel %vm305_vm5, %v300_v52, %v302_v2 }
  0xb1   :  { %v329_v39 = vmul.f32 %v2710_v27, %v309_v16  ;;  %v327_v40 = vmul.f32 %v2714_v31, %v307_v0  ;;  %v328_v41 = vmul.f32 %v2718_v32, %v306_v1 }
  0xb3   :  { %v333_v44 = vpop.permute.xlu1 %332  ;;  %v331_v63 = vpop.permute.xlu0 %330  ;;  %v376_v8 = vpack.c.bf16 %v327_v40, %v294_v37  ;;  %v378_v15 = vpack.c.bf16 %v329_v39, %v296_v20  ;;  %v377_v52 = vpack.c.bf16 %v328_v41, %v295_v38  ;;  %v2759_v20 = vld [vmem:[%s3369_s27 + $0x28] ss:$0 sm:$0xff]  ;;  %v2764_v37 = vld [vmem:[%s3369_s27 + $0x30] ss:$0 sm:$0xff] }
  0xb4   :  { %v341_v24 = vsel %vm338_vm7, %v331_v63, %v333_v44 }
  0xb5   :  { %v359_v13 = vmul.f32 %v2746_v43, %v341_v24  ;;  %413 = vmatprep.subr.bf16.mxu0 %v376_v8  ;;  %454 = vmatprep.subr.bf16.mxu1 %v378_v15  ;;  %v2168_v24 = vld [vmem:[%s3376_s28 + $0x40] sm:$0xff]  }
  0xb6   :  { %414 = vmatpush1.bf16.msra.mxu0 %v375_v35  ;;  %455 = vmatpush1.bf16.msra.mxu1 %v377_v52  ;;  %v2169_v35 = vld [vmem:[%s3376_s28] sm:$0xff]  }
  0xb7   :  { %v337_v2 = vpop.permute.xlu1 %336  ;;  %v335_v17 = vpop.permute.xlu0 %334  ;;  %v379_v38 = vpack.c.bf16 %v359_v13, %v359_v13  ;;  %v2170_v13 = vld [vmem:[%s3376_s28 + $0xc0] sm:$0xff]  }
  0xb8   :  { %v342_v16 = vsel %vm338_vm7, %v337_v2, %v331_v63  ;;  %v339_v1 = vsel %vm338_vm7, %v335_v17, %v337_v2  ;;  %v340_v0 = vsel %vm338_vm7, %v333_v44, %v335_v17  ;;  %v383_v44 = vld [vmem:[%s3375_s3] sm:$0xf]  ;;  %v2172_v17 = vld [vmem:[%s3376_s28 + $0x48] sm:$0xff]  }
  0xb9   :  { %v362_v39 = vmul.f32 %v2754_v3, %v342_v16  ;;  %v360_v40 = vmul.f32 %v2759_v20, %v340_v0  ;;  %v361_v41 = vmul.f32 %v2764_v37, %v339_v1  ;;  %v396_v63 = vsel %vm394_vm8, %v379_v38, 0  ;;  %v2171_v2 = vld [vmem:[%s3376_s28 + $0x80] sm:$0xff]   ;;  %v2173_v16 = vld [vmem:[%s3376_s28 + $0x8] sm:$0xff]   ;;  %v2176_v38 = vld [vmem:[%s3376_s28 + $0x50] sm:$0xff]  }
  0xba   :  { %v2174_v1 = vld [vmem:[%s3376_s28 + $0xc8] sm:$0xff]  }
  0xbb   :  { %v382_v42 = vpack.c.bf16 %v362_v39, %v362_v39  ;;  %v380_v8 = vpack.c.bf16 %v360_v40, %v360_v40  ;;  %v381_v15 = vpack.c.bf16 %v361_v41, %v361_v41  ;;  %v2175_v0 = vld [vmem:[%s3376_s28 + $0x88] sm:$0xff]   ;;  %v2177_v39 = vld [vmem:[%s3376_s28 + $0x10] sm:$0xff]  }
  0xbc   :  { %v2178_v40 = vld [vmem:[%s3376_s28 + $0xd0] sm:$0xff]  }
  0xbd   :  { %1907 = vmatprep.subr.msk.bf16.mxu0 %vm394_vm8, %v380_v8  ;;  %1909 = vmatprep.subr.msk.bf16.mxu1 %vm394_vm8, %v382_v42  ;;  %v402_v52 = vsel %vm394_vm8, %v381_v15, 0  ;;  %v2179_v41 = vld [vmem:[%s3376_s28 + $0x90] sm:$0xff]   ;;  %v2180_v42 = vld [vmem:[%s3376_s28 + $0x58] sm:$0xff]  }
  0xbe   :  { %416 = vmatpush1.bf16.msra.mxu0 %v396_v63  ;;  %457 = vmatpush1.bf16.msra.mxu1 %v402_v52  ;;  %v2181_v8 = vld [vmem:[%s3376_s28 + $0x18] sm:$0xff]  }
  0xbf   :  { %1992 = vmatprep.subr.bf16.mxu0 %v2168_v24  ;;  %2038 = vmatprep.subr.bf16.mxu1 %v2170_v13  ;;  %v2182_v15 = vld [vmem:[%s3376_s28 + $0xd8] sm:$0xff]   ;;  %v2185_v24 = vld [vmem:[%s3376_s28 + $0x20] sm:$0xff]  }
  0xc0   :  { %v2183_v63 = vld [vmem:[%s3376_s28 + $0x98] sm:$0xff]   ;;  %v2187_v13 = vld [vmem:[%s3376_s28 + $0xa0] sm:$0xff]  }
  0xc1   :  { %1908 = vmatmul.mubr.msk.bf16.vlgmr.msra.gmra.mrb[0].mxu0 %vm390_vm9, %v383_v44  ;;  %1910 = vmatmul.mubr.msk.bf16.vlgmr.msra.gmra.mrb[0].mxu1 %vm390_vm9, %v383_v44  ;;  %v2184_v44 = vld [vmem:[%s3376_s28 + $0x60] sm:$0xff]  }
  0xc2   :  { %1993 = vmatpush3.bf16.msra.mxu0 %v2169_v35  ;;  %2039 = vmatpush3.bf16.msra.mxu1 %v2171_v2  ;;  %v2186_v35 = vld [vmem:[%s3376_s28 + $0xe0] sm:$0xff]  }
  0xc3   :  { %1994 = vmatprep.subr.bf16.mxu0 %v2172_v17  ;;  %2040 = vmatprep.subr.bf16.mxu1 %v2174_v1 }
  0xc6   :  { %1995 = vmatpush3.bf16.msra.mxu0 %v2173_v16  ;;  %2041 = vmatpush3.bf16.msra.mxu1 %v2175_v0 }
  0xc7   :  { %1996 = vmatprep.subr.bf16.mxu0 %v2176_v38  ;;  %2042 = vmatprep.subr.bf16.mxu1 %v2178_v40 }
  0xc8   :  { %v388_v52 = vpop.permute.xlu0 %387 }
  0xca   :  { %1997 = vmatpush3.bf16.msra.mxu0 %v2177_v39  ;;  %2043 = vmatpush3.bf16.msra.mxu1 %v2179_v41 }
  0xcb   :  { %1998 = vmatprep.subr.bf16.mxu0 %v2180_v42  ;;  %2044 = vmatprep.subr.bf16.mxu1 %v2182_v15  ;;  %v2188_v42 = vld [vmem:[%s3376_s28 + $0x68] sm:$0xff]  }
  0xcc   :  { %v2190_v15 = vld [vmem:[%s3376_s28 + $0xe8] sm:$0xff]  }
  0xce   :  { %1999 = vmatpush3.bf16.msra.mxu0 %v2181_v8  ;;  %2045 = vmatpush3.bf16.msra.mxu1 %v2183_v63  ;;  %v2189_v8 = vld [vmem:[%s3376_s28 + $0x28] sm:$0xff]  }
  0xcf   :  { %2000 = vmatprep.subr.bf16.mxu0 %v2184_v44  ;;  %2046 = vmatprep.subr.bf16.mxu1 %v2186_v35 }
  0xd2   :  { %2001 = vmatpush3.bf16.msra.mxu0 %v2185_v24  ;;  %2047 = vmatpush3.bf16.msra.mxu1 %v2187_v13 }
  0xd3   :  { %2002 = vmatprep.subr.bf16.mxu0 %v2188_v42  ;;  %2048 = vmatprep.subr.bf16.mxu1 %v2190_v15  ;;  %v2198_v15 = vld [vmem:[%s3376_s28 + $0xf8] sm:$0xff]  }
  0xd6   :  { %2003 = vmatpush3.bf16.msra.mxu0 %v2189_v8  ;;  %v2196_v8 = vld [vmem:[%s3376_s28 + $0x78] sm:$0xff]  }
 0x194   :  { %v482_v2 = vpop.f32.mrb[0].mxu1  ;;  %v441_v17 = vpop.f32.mrb[0].mxu0 }
 0x195   :  { %v483_v16 = vadd.f32 %v482_v2, %v388_v52  ;;  %v442_v1 = vadd.f32 %v441_v17, %v388_v52  ;;  %v443_v0 = vpop.f32.mrb[1].mxu0  ;;  %v484_v38 = vpop.f32.mrb[1].mxu1 }
 0x196   :  { %v444_v39 = vadd.f32 %v443_v0, %v388_v52  ;;  %v445_v40 = vpop.f32.mrb[2].mxu0  ;;  %v486_v41 = vpop.f32.mrb[2].mxu1  ;;  %v485_v2 = vadd.f32 %v484_v38, %v388_v52  ;;  %v2193_v52 = vld [vmem:[%s3376_s28 + $0x30] sm:$0xff]  }
 0x197   :  { %vm491_vm10 = vcmp.gt.f32.partialorder %v483_v16, 0.0  ;;  %v495_v63 = vmul.f32 0.1, %v483_v16  ;;  %vm489_vm11 = vcmp.gt.f32.partialorder %v442_v1, 0.0  ;;  %v493_v44 = vmul.f32 0.1, %v442_v1 }
 0x198   :  { %v494_v13 = vmul.f32 0.1, %v444_v39  ;;  %v446_v17 = vpop.f32.mrb[3].mxu0  ;;  %v487_v0 = vpop.f32.mrb[3].mxu1  ;;  %v2191_v40 = vld [vmem:[%s3376_s28 + $0xa8] sm:$0xff]   ;;  %vm490_vm12 = vcmp.gt.f32.partialorder %v444_v39, 0.0 }
 0x199   :  { %v2853_v24 = vsel %vm491_vm10, %v483_v16, %v495_v63  ;;  %v2855_v35 = vsel %vm489_vm11, %v442_v1, %v493_v44  ;;  %v2192_v16 = vld [vmem:[%s3376_s28 + $0x70] sm:$0xff]   ;;  %2049 = vmatpush3.bf16.msra.mxu1 %v2191_v40  ;;  %v496_v42 = vmul.f32 0.1, %v485_v2  ;;  %vm492_vm13 = vcmp.gt.f32.partialorder %v485_v2, 0.0  ;;  %v2199_v63 = vld [vmem:[%s3376_s28 + $0xb8] sm:$0xff]  }
 0x19a   :  { %505 = vrot.lane.b32.xlu0 %v2853_v24, %s2254_s25  ;;  %501 = vrot.lane.b32.xlu1 %v2855_v35, %s2254_s25  ;;  %v2194_v1 = vld [vmem:[%s3376_s28 + $0xf0] sm:$0xff]   ;;  %v2876_v41 = vsel %vm490_vm12, %v444_v39, %v494_v13  ;;  %v2197_v39 = vld [vmem:[%s3376_s28 + $0x38] sm:$0xff]  }
 0x19b   :  { %2004 = vmatprep.subr.bf16.mxu0 %v2192_v16  ;;  %v2195_v38 = vld [vmem:[%s3376_s28 + $0xb0] sm:$0xff]   ;;  %2050 = vmatprep.subr.bf16.mxu1 %v2194_v1  ;;  %v2894_v44 = vsel %vm492_vm13, %v485_v2, %v496_v42  ;;  %s3380_s28 = smov 111   ;;  %v1060_v13 = vld [vmem:[%s3328_s5] sm:$0xff] }
 0x19c   :  { %2005 = vmatpush3.bf16.msra.mxu0 %v2193_v52  ;;  %v1132_v2 = vld [vmem:[%s3329_s8] sm:$0xff] }
 0x19d   :  { %2051 = vmatpush3.bf16.msra.mxu1 %v2195_v38  ;;  %2006 = vmatprep.subr.bf16.mxu0 %v2196_v8 }
 0x19e   :  { %517 = vrot.lane.b32.xlu0 %v2855_v35, %s2255_s6  ;;  %503 = vrot.lane.b32.xlu1 %v2876_v41, %s2254_s25 }
 0x19f   :  { %2052 = vmatprep.subr.bf16.mxu1 %v2198_v15 }
 0x1a0   :  { %2007 = vmatpush3.bf16.msra.mxu0 %v2197_v39 }
 0x1a1   :  { %2053 = vmatpush3.bf16.msra.mxu1 %v2199_v63 }
 0x1a2   :  { %521 = vrot.lane.b32.xlu0 %v2853_v24, %s2255_s6  ;;  %507 = vrot.lane.b32.xlu1 %v2894_v44, %s2254_s25  ;;  %s3377_s25 = smov 127  }
 0x1a6   :  { %533 = vrot.lane.b32.xlu0 %v2855_v35, %s2256_s29  ;;  %519 = vrot.lane.b32.xlu1 %v2876_v41, %s2255_s6 }
 0x1aa   :  { %537 = vrot.lane.b32.xlu0 %v2853_v24, %s2256_s29  ;;  %523 = vrot.lane.b32.xlu1 %v2894_v44, %s2255_s6  ;;  %s3378_s6 = smov 113  }
 0x1ae   :  { %549 = vrot.lane.b32.xlu0 %v2855_v35, %s2257_s30  ;;  %535 = vrot.lane.b32.xlu1 %v2876_v41, %s2256_s29 }
 0x1b2   :  { %553 = vrot.lane.b32.xlu0 %v2853_v24, %s2257_s30  ;;  %539 = vrot.lane.b32.xlu1 %v2894_v44, %s2256_s29  ;;  %s3379_s29 = smov 112  }
 0x1b6   :  { %569 = vrot.lane.b32.xlu0 %v2855_v35, %s3377_s25  ;;  %551 = vrot.lane.b32.xlu1 %v2876_v41, %s2257_s30 }
 0x1ba   :  { %573 = vrot.lane.b32.xlu0 %v2853_v24, %s3377_s25  ;;  %555 = vrot.lane.b32.xlu1 %v2894_v44, %s2257_s30 }
 0x1be   :  { %585 = vrot.lane.b32.xlu0 %v2855_v35, %s3378_s6  ;;  %571 = vrot.lane.b32.xlu1 %v2876_v41, %s3377_s25 }
 0x1c2   :  { %589 = vrot.lane.b32.xlu0 %v2853_v24, %s3378_s6  ;;  %575 = vrot.lane.b32.xlu1 %v2894_v44, %s3377_s25 }
 0x1c6   :  { %601 = vrot.lane.b32.xlu0 %v2855_v35, %s3379_s29  ;;  %587 = vrot.lane.b32.xlu1 %v2876_v41, %s3378_s6 }
 0x1ca   :  { %605 = vrot.lane.b32.xlu0 %v2853_v24, %s3379_s29  ;;  %591 = vrot.lane.b32.xlu1 %v2894_v44, %s3378_s6  ;;  %s2269_s6 = smov 119  }
 0x1ce   :  { %617 = vrot.lane.b32.xlu0 %v2855_v35, %s3380_s28  ;;  %603 = vrot.lane.b32.xlu1 %v2876_v41, %s3379_s29 }
 0x1d2   :  { %621 = vrot.lane.b32.xlu0 %v2853_v24, %s3380_s28  ;;  %607 = vrot.lane.b32.xlu1 %v2894_v44, %s3379_s29  ;;  %s2270_s29 = smov 120  }
 0x1d6   :  { %1064 = vperm.xlu0 %2166, %v1060_v13   ;;  %619 = vrot.lane.b32.xlu1 %v2876_v41, %s3380_s28 }
 0x1da   :  { %1135 = vperm.xlu0 %2166, %v1132_v2   ;;  %623 = vrot.lane.b32.xlu1 %v2894_v44, %s3380_s28 }
 0x1de   :  { %1069 = vperm.xlu1 %2167, %v1061_v10  }
 0x20c   :  { %v506_v17 = vpop.permute.xlu0 %505  ;;  %v502_v0 = vpop.permute.xlu1 %501 }
 0x210   :  { %v518_v40 = vpop.permute.xlu0 %517  ;;  %v504_v16 = vpop.permute.xlu1 %503 }
 0x211   :  { %v511_v38 = vsel %vm87_vm0, %v502_v0, %v504_v16  ;;  %v510_v48 = vsel %vm87_vm0, %v504_v16, %v506_v17 }
 0x212   :  { %v514_v15 = vmul.f32 %v511_v38, %v2496_v18 }
 0x214   :  { %v522_v52 = vpop.permute.xlu0 %521  ;;  %v508_v1 = vpop.permute.xlu1 %507 }
 0x215   :  { %v509_v2 = vsel %vm87_vm0, %v506_v17, %v508_v1  ;;  %v512_v4 = vsel %vm87_vm0, %v508_v1, %v502_v0  ;;  %v515_v17 = vmul.f32 %v510_v48, %v2515_v23 }
 0x216   :  { %v513_v38 = vmul.f32 %v512_v4, %v2511_v22 }
 0x218   :  { %v534_v42 = vpop.permute.xlu0 %533  ;;  %v520_v8 = vpop.permute.xlu1 %519 }
 0x219   :  { %v527_v39 = vsel %vm120_vm1, %v518_v40, %v520_v8  ;;  %v526_v63 = vsel %vm120_vm1, %v520_v8, %v522_v52  ;;  %v516_v8 = vmul.f32 %v509_v2, %v2531_v30 }
 0x21a   :  { %v530_v13 = vmul.f32 %v527_v39, %v2500_v19  ;;  %v531_v53 = vmul.f32 %v526_v63, %v2527_v29 }
 0x21c   :  { %v538_v49 = vpop.permute.xlu0 %537  ;;  %v524_v36 = vpop.permute.xlu1 %523  ;;  %v634_v28 = vpack.c.bf16 %v530_v13, %v514_v15  ;;  %v635_v63 = vpack.c.bf16 %v531_v53, %v515_v17 }
 0x21d   :  { %v525_v18 = vsel %vm120_vm1, %v522_v52, %v524_v36  ;;  %v528_v19 = vsel %vm120_vm1, %v524_v36, %v518_v40  ;;  %vm1138_vm1 = vcmask 130048  }
 0x21e   :  { %v529_v0 = vmul.f32 %v528_v19, %v2519_v26  ;;  %v532_v1 = vmul.f32 %v525_v18, %v2539_v34  ;;  %941 = vmatprep.mubr.bf16.mxu0 %v634_v28 }
 0x220   :  { %v633_v16 = vpack.c.bf16 %v529_v0, %v513_v38  ;;  %v550_v39 = vpop.permute.xlu0 %549  ;;  %v536_v29 = vpop.permute.xlu1 %535  ;;  %v636_v15 = vpack.c.bf16 %v532_v1, %v516_v8 }
 0x221   :  { %v543_v4 = vsel %vm153_vm2, %v534_v42, %v536_v29  ;;  %v542_v52 = vsel %vm153_vm2, %v536_v29, %v538_v49 }
 0x222   :  { %942 = vmatmul.mubr.bf16.vlgmr.msra.gmra.mrb[4].mxu0 %v633_v16  ;;  %1013 = vmatprep.mubr.bf16.mxu1 %v636_v15  ;;  %v546_v23 = vmul.f32 %v543_v4, %v2564_v57 }
 0x223   :  { %1014 = vmatmul.mubr.bf16.vlgmr.msra.gmra.mrb[4].mxu1 %v635_v63 }
 0x224   :  { %v554_v36 = vpop.permute.xlu0 %553  ;;  %v540_v40 = vpop.permute.xlu1 %539 }
 0x225   :  { %v541_v28 = vsel %vm153_vm2, %v538_v49, %v540_v40  ;;  %v544_v48 = vsel %vm153_vm2, %v540_v40, %v534_v42  ;;  %v547_v49 = vmul.f32 %v542_v52, %v2579_v61 }
 0x226   :  { %v545_v38 = vmul.f32 %v544_v48, %v2575_v60  ;;  %v548_v8 = vmul.f32 %v541_v28, %v2583_v62 }
 0x228   :  { %v570_v22 = vpop.permute.xlu0 %569  ;;  %v552_v26 = vpop.permute.xlu1 %551 }
 0x229   :  { %v559_v30 = vsel %vm186_vm3, %v550_v39, %v552_v26  ;;  %v558_v34 = vsel %vm186_vm3, %v552_v26, %v554_v36 }
 0x22a   :  { %v562_v53 = vmul.f32 %v559_v30, %v2569_v58  ;;  %v563_v19 = vmul.f32 %v558_v34, %v2595_v14 }
 0x22c   :  { %v574_v13 = vpop.permute.xlu0 %573  ;;  %v556_v2 = vpop.permute.xlu1 %555  ;;  %v638_v18 = vpack.c.bf16 %v562_v53, %v546_v23  ;;  %v639_v60 = vpack.c.bf16 %v563_v19, %v547_v49 }
 0x22d   :  { %v557_v57 = vsel %vm186_vm3, %v554_v36, %v556_v2  ;;  %v560_v58 = vsel %vm186_vm3, %v556_v2, %v550_v39 }
 0x22e   :  { %v561_v42 = vmul.f32 %v560_v58, %v2591_v9  ;;  %v564_v0 = vmul.f32 %v557_v57, %v2603_v25  ;;  %949 = vmatprep.mubr.bf16.mxu0 %v638_v18  ;;  %v566_v9 = vmul.f32 %v2876_v41, %v2628_v45  ;;  %v568_v45 = vmul.f32 %v2894_v44, %v2632_v46 }
 0x230   :  { %v586_v1 = vpop.permute.xlu0 %585  ;;  %v572_v17 = vpop.permute.xlu1 %571  ;;  %v637_v14 = vpack.c.bf16 %v561_v42, %v545_v38  ;;  %v640_v16 = vpack.c.bf16 %v564_v0, %v548_v8 }
 0x231   :  { %v578_v29 = vsel %vm239_vm4, %v572_v17, %v574_v13  ;;  %v579_v39 = vsel %vm239_vm4, %v570_v22, %v572_v17 }
 0x232   :  { %v582_v62 = vmul.f32 %v578_v29, %v2654_v5  ;;  %950 = vmatmul.mubr.bf16.gmra.mrb[8].mxu0 %v637_v14  ;;  %1021 = vmatprep.mubr.bf16.mxu1 %v640_v16  ;;  %v581_v61 = vmul.f32 %v579_v39, %v2644_v56  ;;  %v565_v5 = vmul.f32 %v2855_v35, %v2636_v47 }
 0x233   :  { %1022 = vmatmul.mubr.bf16.gmra.mrb[8].mxu1 %v639_v60  ;;  %v567_v56 = vmul.f32 %v2853_v24, %v2640_v55 }
 0x234   :  { %v590_v25 = vpop.permute.xlu0 %589  ;;  %v576_v15 = vpop.permute.xlu1 %575  ;;  %v642_v63 = vpack.c.bf16 %v582_v62, %v566_v9  ;;  %v641_v34 = vpack.c.bf16 %v581_v61, %v565_v5 }
 0x235   :  { %v577_v36 = vsel %vm239_vm4, %v574_v13, %v576_v15  ;;  %v580_v40 = vsel %vm239_vm4, %v576_v15, %v570_v22 }
 0x236   :  { %v583_v4 = vmul.f32 %v577_v36, %v2658_v6  ;;  %v584_v26 = vmul.f32 %v580_v40, %v2648_v59  ;;  %957 = vmatprep.mubr.bf16.mxu0 %v642_v63 }
 0x238   :  { %v602_v30 = vpop.permute.xlu0 %601  ;;  %v588_v23 = vpop.permute.xlu1 %587  ;;  %v644_v53 = vpack.c.bf16 %v584_v26, %v568_v45  ;;  %v643_v28 = vpack.c.bf16 %v583_v4, %v567_v56 }
 0x239   :  { %v594_v59 = vsel %vm272_vm6, %v588_v23, %v590_v25  ;;  %v595_v6 = vsel %vm272_vm6, %v586_v1, %v588_v23 }
 0x23a   :  { %958 = vmatmul.mubr.bf16.gmra.mrb[12].mxu0 %v641_v34  ;;  %1029 = vmatprep.mubr.bf16.mxu1 %v644_v53  ;;  %v597_v52 = vmul.f32 %v595_v6, %v2722_v33  ;;  %v598_v13 = vmul.f32 %v594_v59, %v2692_v51 }
 0x23b   :  { %1030 = vmatmul.mubr.bf16.gmra.mrb[12].mxu1 %v643_v28 }
 0x23c   :  { %v606_v47 = vpop.permute.xlu0 %605  ;;  %v592_v22 = vpop.permute.xlu1 %591 }
 0x23d   :  { %v593_v57 = vsel %vm272_vm6, %v590_v25, %v592_v22  ;;  %v596_v58 = vsel %vm272_vm6, %v592_v22, %v586_v1 }
 0x23e   :  { %v599_v33 = vmul.f32 %v593_v57, %v2698_v7 }
 0x240   :  { %v604_v46 = vpop.permute.xlu1 %603  ;;  %v618_v2 = vpop.permute.xlu0 %617 }
 0x241   :  { %v610_v55 = vsel %vm305_vm5, %v604_v46, %v606_v47  ;;  %v611_v48 = vsel %vm305_vm5, %v602_v30, %v604_v46 }
 0x242   :  { %v613_v18 = vmul.f32 %v611_v48, %v2704_v21  ;;  %v614_v19 = vmul.f32 %v610_v55, %v2714_v31  ;;  %v600_v21 = vmul.f32 %v596_v58, %v2688_v50 }
 0x244   :  { %v608_v38 = vpop.permute.xlu1 %607  ;;  %v646_v8 = vpack.c.bf16 %v614_v19, %v598_v13  ;;  %v645_v42 = vpack.c.bf16 %v613_v18, %v597_v52  ;;  %v622_v1 = vpop.permute.xlu0 %621 }
 0x245   :  { %v609_v0 = vsel %vm305_vm5, %v606_v47, %v608_v38  ;;  %v612_v51 = vsel %vm305_vm5, %v608_v38, %v602_v30 }
 0x246   :  { %v615_v31 = vmul.f32 %v609_v0, %v2718_v32  ;;  %v616_v49 = vmul.f32 %v612_v51, %v2710_v27  ;;  %965 = vmatprep.mubr.bf16.mxu0 %v646_v8 }
 0x247   :  { %966 = vmatmul.mubr.bf16.gmra.mrb[16].mxu0 %v645_v42 }
 0x248   :  { %v620_v17 = vpop.permute.xlu1 %619  ;;  %v648_v14 = vpack.c.bf16 %v616_v49, %v600_v21  ;;  %v647_v16 = vpack.c.bf16 %v615_v31, %v599_v33 }
 0x249   :  { %v626_v29 = vsel %vm338_vm7, %v620_v17, %v622_v1  ;;  %v627_v39 = vsel %vm338_vm7, %v618_v2, %v620_v17 }
 0x24a   :  { %v629_v7 = vmul.f32 %v2746_v43, %v627_v39  ;;  %v630_v50 = vmul.f32 %v2759_v20, %v626_v29  ;;  %1037 = vmatprep.mubr.bf16.mxu1 %v648_v14  ;;  %v2263_v20 = vmov 0.0  }
 0x24b   :  { %1038 = vmatmul.mubr.bf16.gmra.mrb[16].mxu1 %v647_v16  ;;  %2103 = vmatprep.subr.bf16.mxu0 %v2263_v20 }
 0x24c   :  { %v649_v32 = vpack.c.bf16 %v629_v7, %v629_v7  ;;  %v650_v27 = vpack.c.bf16 %v630_v50, %v630_v50  ;;  %v624_v60 = vpop.permute.xlu1 %623  ;;  %2117 = vmatprep.subr.bf16.mxu1 %v2263_v20 }
 0x24d   :  { %v625_v62 = vsel %vm338_vm7, %v622_v1, %v624_v60  ;;  %v628_v9 = vsel %vm338_vm7, %v624_v60, %v618_v2 }
 0x24e   :  { %v631_v61 = vmul.f32 %v2764_v37, %v625_v62  ;;  %v632_v25 = vmul.f32 %v2754_v3, %v628_v9  ;;  %973 = vmatprep.mubr.bf16.mxu0 %v650_v27 }
 0x24f   :  { %974 = vmatmul.mubr.bf16.gmra.mrb[20].mxu0 %v649_v32 }
 0x250   :  { %v651_v43 = vpack.c.bf16 %v631_v61, %v631_v61  ;;  %v652_v15 = vpack.c.bf16 %v632_v25, %v632_v25  ;;  %2113 = vmatprep.mubr.msk.bf16.mxu0 %vm2264_vm14, %v2263_v20 }
 0x252   :  { %1045 = vmatprep.mubr.bf16.mxu1 %v652_v15 }
 0x253   :  { %1046 = vmatmul.mubr.bf16.gmra.mrb[20].mxu1 %v651_v43 }
 0x254   :  { %2119 = vmatprep.mubr.msk.bf16.mxu1 %vm2264_vm14, %v2263_v20 }
 0x2f5   :  { %v2008_v3 = vpop.f32.mrb[4].mxu0 }
 0x2f6   :  { %v2009_v37 = vpop.f32.mrb[5].mxu0  ;;  %v2054_v63 = vpop.f32.mrb[4].mxu1 }
 0x2f7   :  { %v2010_v36 = vadd.f32 %v2009_v37, %v2008_v3  ;;  %v2011_v40 = vpop.f32.mrb[6].mxu0  ;;  %v2055_v5 = vpop.f32.mrb[5].mxu1 }
 0x2f8   :  { %v2056_v4 = vadd.f32 %v2055_v5, %v2054_v63  ;;  %v2012_v26 = vpop.f32.mrb[7].mxu0  ;;  %v2057_v45 = vpop.f32.mrb[6].mxu1 }
 0x2f9   :  { %v2013_v56 = vadd.f32 %v2012_v26, %v2011_v40  ;;  %v2058_v30 = vpop.f32.mrb[7].mxu1 }
 0x2fa   :  { %v1016_v23 = vadd.f32 %v2056_v4, %v2010_v36  ;;  %v2059_v34 = vadd.f32 %v2058_v30, %v2057_v45 }
 0x2fc   :  { %v1019_v53 = vadd.f32 %v2059_v34, %v2013_v56 }
 0x2fe   :  { %v1053_v28 = vpack.c.bf16 %v1019_v53, %v1016_v23 }
 0x300   :  { %2104 = vmatpush3.bf16.msra.mxu0 %v1053_v28 }
 0x301   :  { %2105 = vmatprep.subr.bf16.mxu0 %v2263_v20 }
 0x305   :  { %v2014_v47 = vpop.f32.mrb[8].mxu0 }
 0x306   :  { %v2015_v22 = vpop.f32.mrb[9].mxu0  ;;  %v2060_v59 = vpop.f32.mrb[8].mxu1 }
 0x307   :  { %v2016_v6 = vadd.f32 %v2015_v22, %v2014_v47  ;;  %v2017_v46 = vpop.f32.mrb[10].mxu0  ;;  %v2061_v55 = vpop.f32.mrb[9].mxu1 }
 0x308   :  { %v2062_v48 = vadd.f32 %v2061_v55, %v2060_v59  ;;  %v2018_v52 = vpop.f32.mrb[11].mxu0  ;;  %v2063_v13 = vpop.f32.mrb[10].mxu1  ;;  %v2200_v59 = vld [vmem:[%s3330_s4] sm:$0xff]  }
 0x309   :  { %v2019_v2 = vadd.f32 %v2018_v52, %v2017_v46  ;;  %v2064_v18 = vpop.f32.mrb[11].mxu1  ;;  %v1070_v55 = vpop.permute.xlu1 %1069 }
 0x30a   :  { %v1024_v19 = vadd.f32 %v2062_v48, %v2016_v6  ;;  %v2065_v57 = vadd.f32 %v2064_v18, %v2063_v13  ;;  %v1065_v6 = vpop.permute.xlu0 %1064 }
 0x30c   :  { %v1027_v58 = vadd.f32 %v2065_v57, %v2019_v2 }
 0x30d   :  { %v2020_v38 = vpop.f32.mrb[12].mxu0 }
 0x30e   :  { %v1054_v8 = vpack.c.bf16 %v1027_v58, %v1024_v19  ;;  %v2021_v42 = vpop.f32.mrb[13].mxu0  ;;  %v2066_v0 = vpop.f32.mrb[12].mxu1 }
 0x30f   :  { %v2022_v51 = vadd.f32 %v2021_v42, %v2020_v38  ;;  %v2023_v33 = vpop.f32.mrb[14].mxu0  ;;  %v2067_v21 = vpop.f32.mrb[13].mxu1  ;;  %v1131_v42 = vld [vmem:[%s3331_s7] sm:$0xf]  ;;  %s2268_s7 = smov 121  }
 0x310   :  { %v2068_v31 = vadd.f32 %v2067_v21, %v2066_v0  ;;  %v2024_v49 = vpop.f32.mrb[15].mxu0  ;;  %v2069_v1 = vpop.f32.mrb[14].mxu1  ;;  %2106 = vmatpush3.bf16.msra.mxu0 %v1054_v8 }
 0x311   :  { %v2025_v17 = vadd.f32 %v2024_v49, %v2023_v33  ;;  %v2070_v14 = vpop.f32.mrb[15].mxu1  ;;  %2107 = vmatprep.subr.bf16.mxu0 %v2263_v20  ;;  %v1136_v0 = vpop.permute.xlu0 %1135 }
 0x312   :  { %v1032_v16 = vadd.f32 %v2068_v31, %v2022_v51  ;;  %v2071_v29 = vadd.f32 %v2070_v14, %v2069_v1  ;;  %v1256_v14 = vld [vmem:[%s3333_s10 + $0x8] sm:$0xff] }
 0x314   :  { %v1035_v39 = vadd.f32 %v2071_v29, %v2025_v17  ;;  %v1331_v29 = vld [vmem:[%s3334_s13] sm:$0xff] }
 0x316   :  { %v1055_v7 = vpack.c.bf16 %v1035_v39, %v1032_v16  ;;  %v1255_v16 = vld [vmem:[%s3333_s10] sm:$0xff] }
 0x317   :  { %v1415_v39 = vld [vmem:[%s3335_s15] sm:$0xff] }
 0x318   :  { %2108 = vmatpush3.bf16.msra.mxu0 %v1055_v7  ;;  %v1333_v7 = vld [vmem:[%s3334_s13 + $0x10] sm:$0x3] }
 0x319   :  { %2109 = vmatprep.subr.bf16.mxu0 %v2263_v20 }
 0x31a   :  { %v2026_v50 = vpop.f32.mrb[16].mxu0 }
 0x31b   :  { %v2027_v32 = vpop.f32.mrb[17].mxu0 }
 0x31c   :  { %v2028_v27 = vadd.f32 %v2027_v32, %v2026_v50  ;;  %v2029_v60 = vpop.f32.mrb[18].mxu0  ;;  %v1332_v50 = vld [vmem:[%s3334_s13 + $0x8] sm:$0xff] }
 0x31d   :  { %v2030_v62 = vpop.f32.mrb[19].mxu0  ;;  %v1750_v32 = vld [vmem:[%s3336_s18 + $0x8] sm:$0xff] }
 0x31e   :  { %v2031_v9 = vadd.f32 %v2030_v62, %v2029_v60  ;;  %v2072_v61 = vpop.f32.mrb[16].mxu1  ;;  %v1751_v60 = vld [vmem:[%s3336_s18 + $0x10] sm:$0x3]  ;;  %v1185_v62 = vld [vmem:[%s3337_s11] sm:$0xff] }
 0x31f   :  { %v2073_v25 = vpop.f32.mrb[17].mxu1 }
 0x320   :  { %v2074_v43 = vadd.f32 %v2073_v25, %v2072_v61  ;;  %v2075_v15 = vpop.f32.mrb[18].mxu1  ;;  %v1192_v61 = vrot.slane %v1185_v62, %v2472_v11 }
 0x321   :  { %v2076_v10 = vpop.f32.mrb[19].mxu1 }
 0x322   :  { %v1040_v3 = vadd.f32 %v2074_v43, %v2028_v27  ;;  %v2077_v37 = vadd.f32 %v2076_v10, %v2075_v15  ;;  %v2032_v63 = vpop.f32.mrb[20].mxu0  ;;  %v1749_v27 = vld [vmem:[%s3336_s18] sm:$0xff] }
 0x323   :  { %v2033_v36 = vpop.f32.mrb[21].mxu0 }
 0x324   :  { %v1043_v40 = vadd.f32 %v2077_v37, %v2031_v9  ;;  %v2034_v5 = vadd.f32 %v2033_v36, %v2032_v63  ;;  %v2035_v4 = vpop.f32.mrb[22].mxu0  ;;  %v1199_v9 = vrot.slane %v1185_v62, %v2475_v12  ;;  %v3381_v37 = vld [vmem:[#allocation2_spill] sm:$0xff] }
 0x325   :  { %v2036_v26 = vpop.f32.mrb[23].mxu0  ;;  %v1206_v63 = vrot.slane %v1185_v62, %v3381_v37  ;;  %v2206_v37 = vld [vmem:[%s3339_s16 + $0x4] ss:$16 sps:$4 sm:$0xff]  }
 0x326   :  { %v1056_v45 = vpack.c.bf16 %v1043_v40, %v1040_v3  ;;  %v2078_v56 = vpop.f32.mrb[20].mxu1  ;;  %v1213_v3 = vrot.slane %v1185_v62, %v2559_v54 }
 0x327   :  { %v2079_v30 = vpop.f32.mrb[21].mxu1 }
 0x328   :  { %v2080_v23 = vadd.f32 %v2079_v30, %v2078_v56  ;;  %v2081_v34 = vpop.f32.mrb[22].mxu1  ;;  %2110 = vmatpush3.bf16.msra.mxu0 %v1056_v45  ;;  %v3382_v45 = vld [vmem:[#allocation3_spill] sm:$0xff]  ;;  %v3383_v30 = vld [vmem:[#allocation4_spill] sm:$0xff] }
 0x329   :  { %v2082_v53 = vpop.f32.mrb[23].mxu1  ;;  %2111 = vmatprep.subr.bf16.mxu0 %v2263_v20  ;;  %v1218_v56 = vrot.slane %v1185_v62, %v3382_v45  ;;  %v1225_v12 = vrot.slane %v1185_v62, %v3383_v30  ;;  %v2233_v45 = vld [vmem:[%s3339_s16 + $0x8c] ss:$16 sps:$4 sm:$0xff]   ;;  %v2231_v30 = vld [vmem:[%s3339_s16 + $0x88] ss:$16 sps:$4 sm:$0xff]  }
 0x32a   :  { %v1048_v28 = vadd.f32 %v2080_v23, %v2034_v5  ;;  %v3384_v53 = vld [vmem:[#allocation6_spill] sm:$0xff] }
 0x32c   :  { %v1057_v47 = vpack.c.bf16 %v1048_v28, %v1048_v28  ;;  %v1232_v28 = vrot.slane %v1185_v62, %v3384_v53  ;;  %v2242_v53 = vld [vmem:[%s3339_s16 + $0xc4] ss:$16 sps:$4 sm:$0xff]  }
 0x32e   :  { %v1081_v22 = vsel %vm394_vm8, %v1057_v47, 0 }
 0x32f   :  { %2112 = vmatpush3.bf16.msra.mxu0 %v1081_v22  ;;  %v3385_v22 = vld [vmem:[#allocation5_spill] sm:$0xff] }
 0x330   :  { %2123 = vmatprep.subr.bf16.mxu0 %v2263_v20 }
 0x332   :  { %2114 = vmatmul.mubr.msk.bf16.vlgmr.msra.gmra.mrb[24].mxu0 %vm390_vm9, %v2200_v59  ;;  %v1239_v59 = vrot.slane %v1185_v62, %v3385_v22  ;;  %v2248_v22 = vld [vmem:[%s3339_s16 + $0xe4] ss:$16 sps:$4 sm:$0xff]  }
 0x333   :  { %2133 = vmatprep.mubr.msk.bf16.mxu0 %vm2264_vm14, %v2263_v20 }
 0x405   :  { %v1117_v46 = vpop.f32.mrb[24].mxu0 }
 0x406   :  { %v1118_v48 = vadd.f32 %v1117_v46, %v1065_v6  ;;  %v2115_v52 = vpop.f32.mrb[25].mxu0  ;;  %v1946_v6 = vld [vmem:[%s3337_s11 + $0x8] ss:$0 sm:$0xff] }
 0x407   :  { %v1120_v13 = vpop.f32.mrb[26].mxu0 }
 0x408   :  { %v1126_v2 = vmul.f32 0.1, %v1118_v48  ;;  %v1121_v18 = vadd.f32 %v1120_v13, %v1070_v55  ;;  %v2116_v19 = vpop.f32.mrb[27].mxu0  ;;  %vm1124_vm15 = vcmp.gt.f32.partialorder %v1118_v48, 0.0 }
 0x40a   :  { %vm1125_vm0 = vcmp.gt.f32.partialorder %v1121_v18, 0.0  ;;  %v1127_v57 = vmul.f32 0.1, %v1121_v18  ;;  %v3083_v58 = vsel %vm1124_vm15, %v1118_v48, %v1126_v2 }
 0x40c   :  { %v3085_v38 = vsel %vm1125_vm0, %v1121_v18, %v1127_v57 }
 0x40d   :  { %v1130_v8 = vpack.c.bf16 %v3085_v38, %v3083_v58 }
 0x40f   :  { %2118 = vmatpush3.bf16.msra.mxu1 %v1130_v8  ;;  %v2201_v8 = vld [vmem:[%s3332_s9] sm:$0xff]  }
 0x412   :  { %2120 = vmatmul.mubr.msk.bf16.vlgmr.msra.gmra.mrb[24].mxu1 %vm1138_vm1, %v1131_v42  ;;  %v3386_v42 = vmov 0  }
 0x4e5   :  { %v1176_v51 = vpop.f32.mrb[24].mxu1 }
 0x4e6   :  { %v1177_v33 = vadd.f32 %v1176_v51, %v1136_v0  ;;  %v2121_v21 = vpop.f32.mrb[25].mxu1  ;;  %v2202_v0 = vld [vmem:[%s3338_s12] sm:$0xff]   ;;  %v2207_v51 = vld [vmem:[%s3339_s16 + $0x8] ss:$16 sps:$4 sm:$0xff]  }
 0x4e7   :  { %v1179_v31 = vpop.f32.mrb[26].mxu1  ;;  %2139 = vmatprep.mubr.msk.bf16.mxu1 %vm1138_vm1, %v2202_v0  ;;  %v2213_v21 = vld [vmem:[%s3339_s16 + $0x28] ss:$16 sps:$4 sm:$0xff]  }
 0x4e8   :  { %vm1182_vm2 = vcmp.gt.f32.partialorder %v1177_v33, 0.0  ;;  %v1183_v49 = vmul.f32 0.1, %v1177_v33  ;;  %v2122_v1 = vpop.f32.mrb[27].mxu1  ;;  %v2215_v31 = vld [vmem:[%s3339_s16 + $0x2c] ss:$16 sps:$4 sm:$0xff]  }
 0x4e9   :  { %v2219_v1 = vld [vmem:[%s3339_s16 + $0x48] ss:$16 sps:$4 sm:$0xff]  }
 0x4ea   :  { %v1184_v17 = vsel %vm1182_vm2, %v1177_v33, %v1183_v49  ;;  %v2209_v33 = vld [vmem:[%s3339_s16 + $0xc] ss:$16 sps:$4 sm:$0xff]  }
 0x4eb   :  { %1194 = vrot.lane.b32.xlu0 %v1184_v17, %s2265_s26  ;;  %1187 = vrot.lane.b32.xlu1 %v1184_v17, %s2266_s22  ;;  %v1219_v54 = vmul.f32 %v1218_v56, %v1184_v17  ;;  %v2221_v49 = vld [vmem:[%s3339_s16 + $0x4c] ss:$16 sps:$4 sm:$0xff]   ;;  %v2228_v56 = vld [vmem:[%s3339_s16 + $0x80] ss:$16 sps:$4 sm:$0xff]  }
 0x4ef   :  { %1208 = vrot.lane.b32.xlu0 %v1184_v17, %s2257_s30  ;;  %1201 = vrot.lane.b32.xlu1 %v1184_v17, %s2267_s23 }
 0x4f3   :  { %1227 = vrot.lane.b32.xlu0 %v1184_v17, %s2268_s7  ;;  %1220 = vrot.lane.b32.xlu1 %v1184_v17, %s3377_s25 }
 0x4f7   :  { %1241 = vrot.lane.b32.xlu0 %v1184_v17, %s2269_s6  ;;  %1234 = vrot.lane.b32.xlu1 %v1184_v17, %s2270_s29  ;;  %v2227_v17 = vld [vmem:[%s3339_s16 + $0x6c] ss:$16 sps:$4 sm:$0xff]  }
 0x4fb   :  { %1264 = vperm.xlu0 %2166, %v1256_v14   ;;  %1259 = vperm.xlu1 %2167, %v1255_v16   ;;  %v2225_v14 = vld [vmem:[%s3339_s16 + $0x68] ss:$16 sps:$4 sm:$0xff]  }
 0x4ff   :  { %1336 = vperm.xlu0 %2166, %v1331_v29   ;;  %1418 = vperm.xlu1 %2167, %v1415_v39  }
 0x503   :  { %1346 = vperm.xlu0 %2166, %v1333_v7   ;;  %1341 = vperm.xlu1 %2167, %v1332_v50  }
 0x507   :  { %1759 = vperm.xlu0 %2166, %v1750_v32   ;;  %1754 = vperm.xlu1 %2167, %v1749_v27  }
 0x50b   :  { %1764 = vperm.xlu1 %2167, %v1751_v60  }
 0x55d   :  { %v1195_v25 = vpop.permute.xlu0 %1194  ;;  %v1188_v43 = vpop.permute.xlu1 %1187 }
 0x55e   :  { %v1200_v15 = vmul.f32 %v1199_v9, %v1195_v25  ;;  %v1193_v10 = vmul.f32 %v1192_v61, %v1188_v43 }
 0x560   :  { %v1248_v36 = vpack.c.bf16 %v1200_v15, %v1193_v10 }
 0x561   :  { %v1209_v40 = vpop.permute.xlu0 %1208  ;;  %v1202_v5 = vpop.permute.xlu1 %1201 }
 0x562   :  { %v1214_v4 = vmul.f32 %v1213_v3, %v1209_v40  ;;  %v1207_v26 = vmul.f32 %v1206_v63, %v1202_v5  ;;  %2124 = vmatpush3.bf16.msra.mxu0 %v1248_v36  ;;  %v2203_v3 = vld [vmem:[%s3338_s12 + $0x8] ss:$0 sps:$4 sm:$0x11]   ;;  %v2212_v63 = vld [vmem:[%s3339_s16 + $0x24] ss:$16 sps:$4 sm:$0xff]  }
 0x563   :  { %2125 = vmatprep.subr.bf16.mxu0 %v2263_v20  ;;  %v2218_v36 = vld [vmem:[%s3339_s16 + $0x44] ss:$16 sps:$4 sm:$0xff]   ;;  %v2216_v40 = vld [vmem:[%s3339_s16 + $0x40] ss:$16 sps:$4 sm:$0xff]  }
 0x564   :  { %v1249_v11 = vpack.c.bf16 %v1214_v4, %v1207_v26  ;;  %v2224_v5 = vld [vmem:[%s3339_s16 + $0x64] ss:$16 sps:$4 sm:$0xff]   ;;  %v2222_v4 = vld [vmem:[%s3339_s16 + $0x60] ss:$16 sps:$4 sm:$0xff]  }
 0x565   :  { %v1228_v23 = vpop.permute.xlu0 %1227  ;;  %v1221_v34 = vpop.permute.xlu1 %1220  ;;  %v2230_v26 = vld [vmem:[%s3339_s16 + $0x84] ss:$16 sps:$4 sm:$0xff]  }
 0x566   :  { %v1226_v47 = vmul.f32 %v1225_v12, %v1221_v34  ;;  %2126 = vmatpush3.bf16.msra.mxu0 %v1249_v11  ;;  %v1233_v52 = vmul.f32 %v1232_v28, %v1228_v23  ;;  %v2236_v12 = vld [vmem:[%s3339_s16 + $0xa4] ss:$16 sps:$4 sm:$0xff]   ;;  %v2239_v11 = vld [vmem:[%s3339_s16 + $0xac] ss:$16 sps:$4 sm:$0xff]   ;;  %v2234_v23 = vld [vmem:[%s3339_s16 + $0xa0] ss:$16 sps:$4 sm:$0xff]  }
 0x567   :  { %2127 = vmatprep.subr.bf16.mxu0 %v2263_v20  ;;  %v2237_v34 = vld [vmem:[%s3339_s16 + $0xa8] ss:$16 sps:$4 sm:$0xff]   ;;  %v2245_v28 = vld [vmem:[%s3339_s16 + $0xcc] ss:$16 sps:$4 sm:$0xff]  }
 0x568   :  { %v1250_v46 = vpack.c.bf16 %v1226_v47, %v1219_v54  ;;  %v2240_v54 = vld [vmem:[%s3339_s16 + $0xc0] ss:$16 sps:$4 sm:$0xff]   ;;  %v2243_v47 = vld [vmem:[%s3339_s16 + $0xc8] ss:$16 sps:$4 sm:$0xff]  }
 0x569   :  { %v1242_v55 = vpop.permute.xlu0 %1241  ;;  %v1235_v48 = vpop.permute.xlu1 %1234 }
 0x56a   :  { %v1247_v13 = vmul.f32 %v1946_v6, %v1242_v55  ;;  %v1240_v2 = vmul.f32 %v1239_v59, %v1235_v48  ;;  %2128 = vmatpush3.bf16.msra.mxu0 %v1250_v46  ;;  %v2251_v59 = vld [vmem:[%s3339_s16 + $0xec] ss:$16 sps:$4 sm:$0xff]   ;;  %v2246_v6 = vld [vmem:[%s3339_s16 + $0xe0] ss:$16 sps:$4 sm:$0xff]   ;;  %v2249_v46 = vld [vmem:[%s3339_s16 + $0xe8] ss:$16 sps:$4 sm:$0xff]  }
 0x56b   :  { %2129 = vmatprep.subr.bf16.mxu0 %v2263_v20 }
 0x56c   :  { %v1251_v18 = vpack.c.bf16 %v1240_v2, %v1233_v52  ;;  %v1252_v19 = vpack.c.bf16 %v1247_v13, %v1247_v13 }
 0x56e   :  { %2130 = vmatpush3.bf16.msra.mxu0 %v1251_v18  ;;  %v1276_v57 = vsel %vm394_vm8, %v1252_v19, 0 }
 0x56f   :  { %2131 = vmatprep.subr.bf16.mxu0 %v2263_v20 }
 0x572   :  { %2132 = vmatpush3.bf16.msra.mxu0 %v1276_v57 }
 0x573   :  { %1701 = vmatprep.subr.bf16.mxu0 %v2209_v33 }
 0x575   :  { %2134 = vmatmul.mubr.msk.bf16.vlgmr.msra.gmra.mrb[28].mxu0 %vm390_vm9, %v2201_v8 }
 0x576   :  { %1733 = vmatprep.mubr.bf16.mxu0 %v3386_v42  ;;  %1702 = vmatpush1.bf16.msra.mxu0 %v2207_v51 }
 0x577   :  { %1703 = vmatprep.subr.bf16.mxu0 %v2215_v31 }
 0x57a   :  { %1704 = vmatpush1.bf16.msra.mxu0 %v2213_v21  ;;  %v1260_v16 = vpop.permute.xlu1 %1259  ;;  %v1265_v50 = vpop.permute.xlu0 %1264 }
 0x57b   :  { %1705 = vmatprep.subr.bf16.mxu0 %v2221_v49 }
 0x57e   :  { %1706 = vmatpush1.bf16.msra.mxu0 %v2219_v1  ;;  %v1337_v55 = vpop.permute.xlu0 %1336  ;;  %v1419_v48 = vpop.permute.xlu1 %1418 }
 0x57f   :  { %1707 = vmatprep.subr.bf16.mxu0 %v2227_v17 }
 0x582   :  { %1708 = vmatpush1.bf16.msra.mxu0 %v2225_v14  ;;  %v1347_v52 = vpop.permute.xlu0 %1346  ;;  %v1342_v8 = vpop.permute.xlu1 %1341 }
 0x583   :  { %1709 = vmatprep.subr.bf16.mxu0 %v2233_v45 }
 0x586   :  { %1710 = vmatpush1.bf16.msra.mxu0 %v2231_v30 }
 0x587   :  { %1711 = vmatprep.subr.bf16.mxu0 %v2239_v11 }
 0x58a   :  { %1712 = vmatpush1.bf16.msra.mxu0 %v2237_v34 }
 0x58b   :  { %1713 = vmatprep.subr.bf16.mxu0 %v2245_v28 }
 0x58e   :  { %1714 = vmatpush1.bf16.msra.mxu0 %v2243_v47 }
 0x58f   :  { %1715 = vmatprep.subr.bf16.mxu0 %v2251_v59 }
 0x592   :  { %1716 = vmatpush1.bf16.msra.mxu0 %v2249_v46 }
 0x648   :  { %v1312_v29 = vpop.f32.mrb[28].mxu0 }
 0x649   :  { %v1313_v39 = vadd.f32 %v1312_v29, %v1260_v16  ;;  %v2135_v7 = vpop.f32.mrb[29].mxu0 }
 0x64a   :  { %v1315_v32 = vpop.f32.mrb[30].mxu0 }
 0x64b   :  { %vm1319_vm3 = vcmp.gt.f32.partialorder %v1313_v39, 0.0  ;;  %v1321_v27 = vmul.f32 0.1, %v1313_v39  ;;  %v1316_v60 = vadd.f32 %v1315_v32, %v1265_v50  ;;  %v2136_v62 = vpop.f32.mrb[31].mxu0 }
 0x64d   :  { %v1323_v9 = vsel %vm1319_vm3, %v1313_v39, %v1321_v27  ;;  %vm1320_vm4 = vcmp.gt.f32.partialorder %v1316_v60, 0.0  ;;  %v1322_v61 = vmul.f32 0.1, %v1316_v60 }
 0x64e   :  { %v1325_v43 = vadd.f32 %v1323_v9, %v3083_v58  ;;  %v1414_v58 = vld [vmem:[%s3340_s14] sm:$0xf] }
 0x64f   :  { %v1324_v25 = vsel %vm1320_vm4, %v1316_v60, %v1322_v61 }
 0x650   :  { %v1326_v15 = vadd.f32 %v1324_v25, %v3085_v38  ;;  %v2204_v38 = vld [vmem:[%s3339_s16] ss:$16 sps:$4 sm:$0xff]  }
 0x652   :  { %v1327_v10 = vpack.c.bf16 %v1326_v15, %v1325_v43  ;;  %v2252_v15 = vld [vmem:[%s3342_s17] sm:$0xff]  }
 0x654   :  { %2137 = vmatprep.subr.bf16.mxu1 %v1327_v10 }
 0x655   :  { %2138 = vmatpush3.bf16.msra.mxu1 %v1327_v10 }
 0x656   :  { %2143 = vmatprep.subr.bf16.mxu1 %v2263_v20 }
 0x658   :  { %2140 = vmatmul.mubr.msk.bf16.vlgmr.msra.gmra.mrb[28].mxu1 %vm1138_vm1, %v2203_v3 }
 0x659   :  { %2144 = vmatpush3.bf16.msra.mxu1 %v1327_v10  ;;  %2145 = vmatprep.mubr.msk.bf16.mxu1 %vm2264_vm14, %v2263_v20  ;;  %v2210_v20 = vld [vmem:[%s3339_s16 + $0x20] ss:$16 sps:$4 sm:$0xff]  }
 0x65a   :  { %1660 = vmatprep.subr.bf16.mxu1 %v2206_v37 }
 0x660   :  { %2146 = vmatmul.mubr.msk.bf16.vlgmr.msra.gmra.mrb[32].mxu1 %vm1138_vm1, %v1414_v58 }
 0x661   :  { %1661 = vmatpush1.bf16.msra.mxu1 %v2204_v38  ;;  %1692 = vmatprep.mubr.bf16.mxu1 %v3386_v42 }
 0x662   :  { %1662 = vmatprep.subr.bf16.mxu1 %v2212_v63 }
 0x665   :  { %1663 = vmatpush1.bf16.msra.mxu1 %v2210_v20 }
 0x666   :  { %1664 = vmatprep.subr.bf16.mxu1 %v2218_v36 }
 0x669   :  { %1665 = vmatpush1.bf16.msra.mxu1 %v2216_v40 }
 0x66a   :  { %1666 = vmatprep.subr.bf16.mxu1 %v2224_v5 }
 0x66d   :  { %1667 = vmatpush1.bf16.msra.mxu1 %v2222_v4 }
 0x66e   :  { %1668 = vmatprep.subr.bf16.mxu1 %v2230_v26 }
 0x671   :  { %1669 = vmatpush1.bf16.msra.mxu1 %v2228_v56 }
 0x672   :  { %1670 = vmatprep.subr.bf16.mxu1 %v2236_v12 }
 0x675   :  { %1671 = vmatpush1.bf16.msra.mxu1 %v2234_v23 }
 0x676   :  { %1672 = vmatprep.subr.bf16.mxu1 %v2242_v53 }
 0x679   :  { %1673 = vmatpush1.bf16.msra.mxu1 %v2240_v54 }
 0x67a   :  { %1674 = vmatprep.subr.bf16.mxu1 %v2248_v22 }
 0x67d   :  { %1675 = vmatpush1.bf16.msra.mxu1 %v2246_v6 }
 0x72b   :  { %v2141_v13 = vpop.f32.mrb[28].mxu1 }
 0x72c   :  { %v1406_v2 = vadd.f32 %v2141_v13, %v1347_v52  ;;  %v1397_v18 = vpop.f32.mrb[29].mxu1 }
 0x72d   :  { %v1398_v19 = vadd.f32 %v1397_v18, %v1337_v55  ;;  %v2142_v57 = vpop.f32.mrb[30].mxu1 }
 0x72e   :  { %1413 = vst [vmem:[%s3341_s19 + $0x10] sm:$0x3] %v1406_v2  ;;  %v1400_v0 = vpop.f32.mrb[31].mxu1 }
 0x72f   :  { %1411 = vst [vmem:[%s3341_s19] sm:$0xff] %v1398_v19  ;;  %v1401_v51 = vadd.f32 %v1400_v0, %v1342_v8 }
 0x731   :  { %1412 = vst [vmem:[%s3341_s19 + $0x8] sm:$0xff] %v1401_v51 }
 0x733   :  { %v1458_v33 = vpop.f32.mrb[32].mxu1 }
 0x734   :  { %v1459_v21 = vadd.f32 %v1458_v33, %v1419_v48  ;;  %v2147_v31 = vpop.f32.mrb[33].mxu1 }
 0x735   :  { %v1461_v49 = vpop.f32.mrb[34].mxu1 }
 0x736   :  { %vm1464_vm5 = vcmp.gt.f32.partialorder %v1459_v21, 0.0  ;;  %v1465_v1 = vmul.f32 0.1, %v1459_v21  ;;  %v2148_v17 = vpop.f32.mrb[35].mxu1 }
 0x738   :  { %v1466_v14 = vsel %vm1464_vm5, %v1459_v21, %v1465_v1 }
 0x739   :  { %v1467_v16 = vpack.c.bf16 %v1466_v14, %v1466_v14 }
 0x73b   :  { %1693 = vmatmul.mubr.bf16.vlgmr.msra.gmra.mrb[36].mxu1 %v1467_v16  ;;  %1734 = vmatmul.mubr.bf16.vlgmr.msra.gmra.mrb[32].mxu0 %v1467_v16 }
 0x73c   :  { %1813 = vmatprep.mubr.bf16.mxu1 %v3386_v42  ;;  %1864 = vmatprep.mubr.bf16.mxu0 %v3386_v42 }
 0x80e   :  { %v1694_v29 = vpop.f32.mrb[36].mxu1  ;;  %v1735_v39 = vpop.f32.mrb[32].mxu0 }
 0x80f   :  { %v1696_v7 = vpop.f32.mrb[37].mxu1  ;;  %v1737_v50 = vpop.f32.mrb[33].mxu0  ;;  %v1742_v9 = vpack.c.bf16 %v2855_v35, %v1694_v29  ;;  %v1744_v61 = vpack.c.bf16 %v2853_v24, %v1735_v39  ;;  %v2253_v24 = vld [vmem:[%s3342_s17 + $0x8] ss:$0 sps:$4 sm:$0x11]  }
 0x810   :  { %v1743_v32 = vpack.c.bf16 %v2876_v41, %v1696_v7  ;;  %v1745_v27 = vpack.c.bf16 %v2894_v44, %v1737_v50  ;;  %v1698_v60 = vpop.f32.mrb[38].mxu1  ;;  %v1739_v62 = vpop.f32.mrb[34].mxu0 }
 0x811   :  { %v1699_v25 = vpop.f32.mrb[39].mxu1  ;;  %v1740_v43 = vpop.f32.mrb[35].mxu0 }
 0x812   :  { %1781 = vmatprep.subr.bf16.mxu1 %v1743_v32  ;;  %1832 = vmatprep.subr.bf16.mxu0 %v1745_v27  ;;  %v1760_v35 = vpop.permute.xlu0 %1759  ;;  %v1755_v41 = vpop.permute.xlu1 %1754 }
 0x813   :  { %1782 = vmatpush1.bf16.msra.mxu1 %v1742_v9  ;;  %1833 = vmatpush1.bf16.msra.mxu0 %v1744_v61 }
 0x816   :  { %1988 = vmatmul.mubr.msk.bf16.vlgmr.msra.gmra.mrb[40].mxu1 %vm1138_vm1, %v2252_v15  ;;  %1990 = vmatmul.mubr.msk.bf16.vlgmr.msra.gmra.mrb[36].mxu0 %vm1138_vm1, %v2252_v15  ;;  %v1765_v30 = vpop.permute.xlu1 %1764 }
 0x817   :  { %1823 = vmatprep.mubr.bf16.mxu1 %v3386_v42  ;;  %1874 = vmatprep.mubr.bf16.mxu0 %v3386_v42 }
 0x81e   :  { %1989 = vmatmul.mubr.msk.bf16.gmra.mrb[44].mxu1 %vm1138_vm1, %v2253_v24  ;;  %1991 = vmatmul.mubr.msk.bf16.gmra.mrb[40].mxu0 %vm1138_vm1, %v2253_v24 }
 0x8e9   :  { %v1815_v44 = vpop.f32.mrb[40].mxu1  ;;  %v1866_v10 = vpop.f32.mrb[36].mxu0 }
 0x8ea   :  { %v1816_v3 = vadd.f32 %v1815_v44, %v1755_v41  ;;  %v1867_v37 = vadd.f32 %v1866_v10, %v1755_v41  ;;  %v1817_v58 = vpop.f32.mrb[41].mxu1  ;;  %v1868_v38 = vpop.f32.mrb[37].mxu0 }
 0x8eb   :  { %v1818_v63 = vadd.f32 %v1817_v58, %v1755_v41  ;;  %v1869_v20 = vadd.f32 %v1868_v38, %v1755_v41  ;;  %v1819_v36 = vpop.f32.mrb[42].mxu1  ;;  %v1870_v42 = vpop.f32.mrb[38].mxu0 }
 0x8ec   :  { %1883 = vst [vmem:[%s3343_s20] sm:$0xff] %v1816_v3  ;;  %1885 = vst [vmem:[%s3343_s20 + $0x10] sm:$0xff] %v1867_v37  ;;  %v1820_v40 = vadd.f32 %v1819_v36, %v1760_v35  ;;  %v1871_v5 = vadd.f32 %v1870_v42, %v1760_v35  ;;  %v1821_v4 = vpop.f32.mrb[43].mxu1  ;;  %v1872_v26 = vpop.f32.mrb[39].mxu0 }
 0x8ed   :  { %1884 = vst [vmem:[%s3343_s20 + $0x8] sm:$0xff] %v1818_v63  ;;  %1886 = vst [vmem:[%s3343_s20 + $0x18] sm:$0xff] %v1869_v20  ;;  %v1822_v45 = vadd.f32 %v1821_v4, %v1760_v35  ;;  %v1873_v56 = vadd.f32 %v1872_v26, %v1760_v35 }
 0x8ee   :  { %1887 = vst [vmem:[%s3343_s20 + $0x20] sm:$0xff] %v1820_v40  ;;  %1889 = vst [vmem:[%s3343_s20 + $0x30] sm:$0xff] %v1871_v5 }
 0x8ef   :  { %1888 = vst [vmem:[%s3343_s20 + $0x28] sm:$0xff] %v1822_v45  ;;  %1890 = vst [vmem:[%s3343_s20 + $0x38] sm:$0xff] %v1873_v56 }
 0x8f1   :  { %v1825_v12 = vpop.f32.mrb[44].mxu1  ;;  %v1876_v11 = vpop.f32.mrb[40].mxu0 }
 0x8f2   :  { %v1826_v23 = vadd.f32 %v1825_v12, %v1765_v30  ;;  %v1877_v34 = vadd.f32 %v1876_v11, %v1765_v30  ;;  %v1827_v53 = vpop.f32.mrb[45].mxu1  ;;  %v1878_v28 = vpop.f32.mrb[41].mxu0 }
 0x8f3   :  { %v1828_v54 = vadd.f32 %v1827_v53, %v1765_v30  ;;  %v1879_v47 = vadd.f32 %v1878_v28, %v1765_v30  ;;  %v1829_v22 = vpop.f32.mrb[46].mxu1  ;;  %v1880_v59 = vpop.f32.mrb[42].mxu0 }
 0x8f4   :  { %1891 = vst [vmem:[%s3343_s20 + $0x40] sm:$0x3] %v1826_v23  ;;  %1893 = vst [vmem:[%s3343_s20 + $0x50] sm:$0x3] %v1877_v34  ;;  %v1830_v6 = vpop.f32.mrb[47].mxu1  ;;  %v1881_v46 = vpop.f32.mrb[43].mxu0 }
 0x8f5   :  { %1892 = vst [vmem:[%s3343_s20 + $0x48] sm:$0x3] %v1828_v54  ;;  %1894 = vst [vmem:[%s3343_s20 + $0x58] sm:$0x3] %v1879_v47 }

</bundles_post_ra>
